<compile_context>
chip_gen: v6e
topology: v6e:2x2x1
jax: 0.10.0
libtpu: 0.0.40
codegen_flags: <defaults>
</compile_context>

<pallas_src>
import functools

import jax
import jax.numpy as jnp
from jax import lax
from jax.experimental import pallas as pl
from jax.experimental.pallas import tpu as pltpu


_LANE = 128      # TPU lane width
_SUBLANE = 8     # TPU sublane width


def _round_up(x, m):
    return ((x + m - 1) // m) * m


def _pick_time_chunk(t, rows_per_step, e, itemsize, budget_bytes):
    """Prefer the whole sequence resident (single grid step, x fetched once).
    Otherwise pick the largest divisor of t whose chunked footprint
    (2 directions x 2 pipeline buffers) fits the budget."""
    if t * rows_per_step * e * itemsize <= budget_bytes:
        return t
    for tc in range(t - 1, 0, -1):
        if t % tc == 0 and 4 * tc * rows_per_step * e * itemsize <= budget_bytes:
            return tc
    return 1


def _time_major(x_bte, bp, dtype):
    """(B,T,E) -> time-major (T*B_pad, E), batch zero-padded to a multiple of 8
    so every per-step row slice inside the kernel is sublane aligned."""
    b, t, e = x_bte.shape
    x = jnp.transpose(x_bte, (1, 0, 2))
    if bp != b:
        x = jnp.pad(x, ((0, 0), (0, bp - b), (0, 0)))
    return x.reshape(t * bp, e).astype(dtype)


# ----------------------------------------------------------------------------
# Shared chunk body: advance the fused fwd+bwd recurrence by one time chunk.
# ----------------------------------------------------------------------------
def _birnn_chunk(x_fwd_ref, x_bwd_ref, wih_ref, whh_ref, bias_ref, h_ref,
                 *, bp, chunk, hsz, shared_x):
    """x_*_ref: (chunk*bp, E) time-major rows (bwd ref holds the mirror chunk;
    when shared_x both names point at the same full-sequence block).
    h_ref: VMEM scratch (bp, W) carrying [h_fwd | h_bwd | 0-pad] across steps."""
    w = whh_ref.shape[1]

    @pl.when(pl.program_id(0) == 0)
    def _init():
        h_ref[...] = jnp.zeros_like(h_ref)

    wih = wih_ref[...]
    bias = bias_ref[...]
    # Hoisted input projection: one (chunk*bp, E) @ (E, W) bf16 matmul with
    # f32 accumulation.  Columns [0:H) are the forward projection, [H:2H) the
    # backward projection of the SAME row's timestep; directions pick their
    # own lanes below.  Combined bias (b_ih + b_hh per direction) folded in.
    p_fwd = jnp.dot(x_fwd_ref[...], wih,
                    preferred_element_type=jnp.float32) + bias
    if shared_x:
        p_bwd = p_fwd                      # whole sequence resident: one matmul
    else:
        p_bwd = jnp.dot(x_bwd_ref[...], wih,
                        preferred_element_type=jnp.float32) + bias

    # Lanes [0,H) = forward state, [H,2H) = backward state, rest stays 0.
    fwd_lane = lax.broadcasted_iota(jnp.int32, (bp, w), 1) < hsz
    whh = whh_ref[...]                     # f32 block-diagonal recurrent matrix
    h = h_ref[...]
    for tt in range(chunk):                # static unroll (LLO visibility)
        rr = chunk - 1 - tt                # backward dir walks time in reverse
        p_t = jnp.where(fwd_lane,
                        p_fwd[tt * bp:(tt + 1) * bp, :],
                        p_bwd[rr * bp:(rr + 1) * bp, :])
        h = jnp.tanh(jnp.dot(h, whh, preferred_element_type=jnp.float32) + p_t)
    h_ref[...] = h


# ----------------------------------------------------------------------------
# Kernel 1: text RNN -> final hidden [h_fwd | h_bwd | 0-pad]  (B_pad, W)
# ----------------------------------------------------------------------------
def _rnn_last_hidden_kernel(*refs, bp, chunk, hsz, shared_x):
    if shared_x:
        x_ref, wih_ref, whh_ref, b_ref, h_out_ref, h_state = refs
        x_fwd, x_bwd = x_ref, x_ref
    else:
        x_fwd, x_bwd, wih_ref, whh_ref, b_ref, h_out_ref, h_state = refs
    _birnn_chunk(x_fwd, x_bwd, wih_ref, whh_ref, b_ref, h_state,
                 bp=bp, chunk=chunk, hsz=hsz, shared_x=shared_x)

    @pl.when(pl.program_id(0) == pl.num_programs(0) - 1)
    def _write():
        h_out_ref[...] = h_state[...]


def birnn_final_hidden(x_bte, rnn_p, *, input_vmem_budget_bytes=12 << 20):
    b, t, e = x_bte.shape
    bp = _round_up(b, _SUBLANE)
    w = rnn_p["whh"].shape[1]
    x_dtype = rnn_p["wih"].dtype
    x_tm = _time_major(x_bte, bp, x_dtype)
    tc = _pick_time_chunk(t, bp, e, jnp.dtype(x_dtype).itemsize,
                          input_vmem_budget_bytes)
    n_chunks = t // tc
    rows = tc * bp
    shared = n_chunks == 1

    const = lambda i: (0, 0)
    if shared:
        x_specs = [pl.BlockSpec((rows, e), lambda i: (0, 0))]
        x_args = (x_tm,)
    else:
        x_specs = [pl.BlockSpec((rows, e), lambda i: (i, 0)),
                   pl.BlockSpec((rows, e), lambda i: (n_chunks - 1 - i, 0))]
        x_args = (x_tm, x_tm)

    grid_spec = pltpu.PrefetchScalarGridSpec(
        num_scalar_prefetch=0,
        grid=(n_chunks,),
        in_specs=x_specs + [
            pl.BlockSpec((e, w), const),
            pl.BlockSpec((w, w), const),
            pl.BlockSpec((1, w), const),
        ],
        out_specs=pl.BlockSpec((bp, w), const),
        scratch_shapes=[pltpu.VMEM((bp, w), jnp.float32)],
    )
    return pl.pallas_call(
        functools.partial(_rnn_last_hidden_kernel, bp=bp, chunk=tc,
                          hsz=rnn_p["hidden"], shared_x=shared),
        grid_spec=grid_spec,
        out_shape=jax.ShapeDtypeStruct((bp, w), jnp.float32),
        compiler_params=pltpu.CompilerParams(dimension_semantics=("arbitrary",)),
    )(*x_args, rnn_p["wih"], rnn_p["whh"], rnn_p["b"])


# ----------------------------------------------------------------------------
# Kernel 2: timeline RNN + per-segment mean/min/max + fused MLP head.
# ----------------------------------------------------------------------------
def _timeline_head_kernel(*refs, bp, chunk, hsz, shared_x):
    off_ref = refs[0]
    if shared_x:
        (x_ref, wih_ref, whh_ref, b_ref, hn_ref, nf_ref,
         w1h_ref, w1n_ref, w1s_ref, b1_ref, w2_ref, b2_ref,
         out_ref, h_state) = refs[1:]
        x_fwd, x_bwd = x_ref, x_ref
    else:
        (x_fwd, x_bwd, wih_ref, whh_ref, b_ref, hn_ref, nf_ref,
         w1h_ref, w1n_ref, w1s_ref, b1_ref, w2_ref, b2_ref,
         out_ref, h_state) = refs[1:]

    _birnn_chunk(x_fwd, x_bwd, wih_ref, whh_ref, b_ref, h_state,
                 bp=bp, chunk=chunk, hsz=hsz, shared_x=shared_x)

    @pl.when(pl.program_id(0) == pl.num_programs(0) - 1)
    def _finalize():
        # --- per-segment statistics: h2_n never leaves VMEM -----------------
        h2 = h_state[...]                                    # (bp, W)
        s_rows = hn_ref.shape[0]                             # padded batch rows
        bp2 = h2.shape[0]
        r_iota = lax.broadcasted_iota(jnp.int32, (s_rows, bp2), 1)
        s_iota = lax.broadcasted_iota(jnp.int32, (s_rows, bp2), 0)
        # seg_of_r[.,r] = index of the segment row r belongs to (== s_rows if
        # r is a zero-padded timeline row -> excluded from every segment).
        seg_of_r = jnp.zeros((s_rows, bp2), jnp.int32)
        for s in range(1, s_rows + 1):                       # static unroll
            seg_of_r = seg_of_r + (r_iota >= off_ref[s]).astype(jnp.int32)
        mask = seg_of_r == s_iota                            # (s_rows, bp2)
        maskf = mask.astype(jnp.float32)
        cnt = jnp.sum(maskf, axis=1, keepdims=True)          # (s_rows, 1)
        inv = jnp.where(cnt > 0.0, 1.0 / jnp.maximum(cnt, 1.0), 0.0)
        # Mean as ONE MXU matmul with the normalized selection matrix.
        seg_mean = jnp.dot(maskf * inv, h2, preferred_element_type=jnp.float32)
        # Min/max: vectorized masked reductions over the row axis.
        m3 = mask[:, :, None]
        h2b = h2[None, :, :]
        seg_min = jnp.min(jnp.where(m3, h2b, jnp.inf), axis=1)
        seg_max = jnp.max(jnp.where(m3, h2b, -jnp.inf), axis=1)
        nonempty = cnt > 0.0                                 # guard padded/empty
        seg_min = jnp.where(nonempty, seg_min, 0.0)
        seg_max = jnp.where(nonempty, seg_max, 0.0)
        stats = jnp.concatenate([seg_mean, seg_min, seg_max], axis=1)  # (s_rows, 3W)

        # --- fused head: concat realized as split fc1 weight rows -----------
        z1 = (jnp.dot(hn_ref[...], w1h_ref[...], preferred_element_type=jnp.float32)
              + jnp.dot(nf_ref[...], w1n_ref[...], preferred_element_type=jnp.float32)
              + jnp.dot(stats, w1s_ref[...], preferred_element_type=jnp.float32)
              + b1_ref[...])
        hidden = jnp.tanh(z1)
        z2 = (jnp.dot(hidden, w2_ref[...], preferred_element_type=jnp.float32)
              + b2_ref[...])
        out_ref[...] = 1.0 / (1.0 + jnp.exp(-z2))            # exact sigmoid


def timeline_birnn_head(x_nte, rnn_p, offsets, h_n, normal_features, kp,
                        *, input_vmem_budget_bytes=12 << 20):
    n, t, e = x_nte.shape
    b = normal_features.shape[0]
    bp_out = h_n.shape[0]                      # round_up(B, 8)
    bp2 = _round_up(n, _SUBLANE)               # padded timeline rows
    w = rnn_p["whh"].shape[1]
    x_dtype = rnn_p["wih"].dtype
    x_tm = _time_major(x_nte, bp2, x_dtype)
    tc = _pick_time_chunk(t, bp2, e, jnp.dtype(x_dtype).itemsize,
                          input_vmem_budget_bytes)
    n_chunks = t // tc
    rows = tc * bp2
    shared = n_chunks == 1

    nf_p = jnp.pad(normal_features.astype(jnp.float32),
                   ((0, bp_out - b), (0, 0)))
    # Pad offsets to bp_out+1 entries; padded segments are empty -> zero stats
    # rows that multiply zero-padded head rows (sliced off by the caller).
    off_p = jnp.concatenate(
        [offsets.astype(jnp.int32),
         jnp.full((bp_out - b,), offsets[-1], jnp.int32)])

    f = nf_p.shape[1]
    hidp = kp["w2"].shape[0]
    outp = kp["w2"].shape[1]
    const = lambda i, off: (0, 0)
    if shared:
        x_specs = [pl.BlockSpec((rows, e), lambda i, off: (0, 0))]
        x_args = (x_tm,)
    else:
        x_specs = [pl.BlockSpec((rows, e), lambda i, off: (i, 0)),
                   pl.BlockSpec((rows, e), lambda i, off: (n_chunks - 1 - i, 0))]
        x_args = (x_tm, x_tm)

    grid_spec = pltpu.PrefetchScalarGridSpec(
        num_scalar_prefetch=1,
        grid=(n_chunks,),
        in_specs=x_specs + [
            pl.BlockSpec((e, w), const),
            pl.BlockSpec((w, w), const),
            pl.BlockSpec((1, w), const),
            pl.BlockSpec((bp_out, w), const),      # h_n from kernel 1
            pl.BlockSpec((bp_out, f), const),      # normal_features
            pl.BlockSpec((w, hidp), const),        # fc1 rows for h_n
            pl.BlockSpec((f, hidp), const),        # fc1 rows for normal_features
            pl.BlockSpec((3 * w, hidp), const),    # fc1 rows for [mean|min|max]
            pl.BlockSpec((1, hidp), const),        # fc1 bias
            pl.BlockSpec((hidp, outp), const),     # fc2 weight
            pl.BlockSpec((1, outp), const),        # fc2 bias
        ],
        out_specs=pl.BlockSpec((bp_out, outp), const),
        scratch_shapes=[pltpu.VMEM((bp2, w), jnp.float32)],
    )
    return pl.pallas_call(
        functools.partial(_timeline_head_kernel, bp=bp2, chunk=tc,
                          hsz=rnn_p["hidden"], shared_x=shared),
        grid_spec=grid_spec,
        out_shape=jax.ShapeDtypeStruct((bp_out, outp), jnp.float32),
        compiler_params=pltpu.CompilerParams(dimension_semantics=("arbitrary",)),
    )(off_p, *x_args, rnn_p["wih"], rnn_p["whh"], rnn_p["b"],
      h_n, nf_p, kp["w1_h"], kp["w1_nf"], kp["w1_s"], kp["b1"],
      kp["w2"], kp["b2"])


# ----------------------------------------------------------------------------
# Full forward (dropout p=0 -> identity, so it is omitted).  Two launches.
# ----------------------------------------------------------------------------
def timeline_rnn_forward(kp, normal_features, text_features,
                         timeline_text_features, timeline_offsets,
                         *, input_vmem_budget_bytes=12 << 20):
    b = normal_features.shape[0]
    # self.rnn(text_features) -> h_n  (B_pad, W)
    h_n = birnn_final_hidden(text_features, kp["rnn"],
                             input_vmem_budget_bytes=input_vmem_budget_bytes)
    # self.timeline_rnn + split/mean/min/max + concat + fc1 + tanh + fc2 +
    # sigmoid, all fused into the second kernel's last grid step.
    out_padded = timeline_birnn_head(
        timeline_text_features, kp["timeline_rnn"], timeline_offsets,
        h_n, normal_features, kp,
        input_vmem_budget_bytes=input_vmem_budget_bytes)
    return out_padded[:b, :kp["out_features"]]


# ----------------------------------------------------------------------------
# Parameter construction / padding to kernel layout.
# ----------------------------------------------------------------------------
def make_rnn_params(key, embed, hidden):
    ks = jax.random.split(key, 6)
    u = lambda k, shape: jax.random.uniform(k, shape, jnp.float32, -0.1, 0.1)
    return {
        "wih_f": u(ks[0], (embed, hidden)),
        "whh_f": u(ks[1], (hidden, hidden)),
        "b_f": u(ks[2], (1, hidden)),   # combined bias b_ih + b_hh
        "wih_b": u(ks[3], (embed, hidden)),
        "whh_b": u(ks[4], (hidden, hidden)),
        "b_b": u(ks[5], (1, hidden)),
    }


def _pad2(a, rows, cols):
    return jnp.pad(a, ((0, rows - a.shape[0]), (0, cols - a.shape[1])))


def _pad_row_blocks(w, real, padded):
    """Pad each `real`-row block of w to `padded` rows (zero filler rows)."""
    nblk = w.shape[0] // real
    return jnp.concatenate(
        [jnp.pad(w[i * real:(i + 1) * real], ((0, padded - real), (0, 0)))
         for i in range(nblk)], axis=0)


def build_kernel_params(logical, *, in_features, hidden, out_features,
                        x_dtype=jnp.bfloat16):
    """Build the fused-direction, 128-lane-padded kernel parameter layout.
    Zero padding is exact: padded hidden lanes stay identically 0 through the
    tanh recurrence (zero columns in Wih/Whh/bias) and carry zero weight
    downstream.  x / Wih are stored in `x_dtype` (bf16 by default) with f32
    accumulation; the recurrent matrix, biases and head weights stay f32."""
    h = hidden
    w = _round_up(2 * h, _LANE)            # combined fwd+bwd lane width
    fc_hidden = logical["fc1_b"].shape[1]
    hidp = _round_up(fc_hidden, _LANE)
    outp = _round_up(out_features, _LANE)

    def combine_rnn(p):
        e = p["wih_f"].shape[0]
        wih = jnp.zeros((e, w), jnp.float32)
        wih = wih.at[:, :h].set(p["wih_f"]).at[:, h:2 * h].set(p["wih_b"])
        whh = jnp.zeros((w, w), jnp.float32)   # block-diagonal [Whh_f ; Whh_b]
        whh = whh.at[:h, :h].set(p["whh_f"]).at[h:2 * h, h:2 * h].set(p["whh_b"])
        bias = jnp.zeros((1, w), jnp.float32)
        bias = bias.at[:, :h].set(p["b_f"]).at[:, h:2 * h].set(p["b_b"])
        return {"wih": wih.astype(x_dtype), "whh": whh, "b": bias, "hidden": h}

    fc1_w = logical["fc1_w"]                   # (2H + F + 6H, HID)
    w1_h = fc1_w[:2 * h]                       # rows for h_n = [fwd H | bwd H]
    w1_nf = fc1_w[2 * h:2 * h + in_features]   # rows for normal_features
    w1_s = fc1_w[2 * h + in_features:]         # rows for [mean(2H)|min(2H)|max(2H)]
    return {
        "rnn": combine_rnn(logical["rnn"]),
        "timeline_rnn": combine_rnn(logical["timeline_rnn"]),
        "w1_h": _pad2(w1_h, w, hidp),
        "w1_nf": _pad2(w1_nf, in_features, hidp),
        "w1_s": _pad2(_pad_row_blocks(w1_s, 2 * h, w), 3 * w, hidp),
        "b1": _pad2(logical["fc1_b"], 1, hidp),
        "w2": _pad2(logical["fc2_w"], hidp, outp),
        "b2": _pad2(logical["fc2_b"], 1, outp),
        "out_features": out_features,
    }


# ----------------------------------------------------------------------------
# Pure-JAX reference (same fixed-length-sequence semantics) for verification.
# ----------------------------------------------------------------------------
def reference_forward(logical, normal_features, text_features,
                      timeline_text_features, timeline_elements):
    def rnn_last(x, wih, whh, b):
        h = jnp.zeros((x.shape[0], whh.shape[0]), jnp.float32)
        for t in range(x.shape[1]):
            h = jnp.tanh(x[:, t, :] @ wih + h @ whh + b)
        return h

    def birnn(x, p):
        hf = rnn_last(x, p["wih_f"], p["whh_f"], p["b_f"])
        hb = rnn_last(x[:, ::-1, :], p["wih_b"], p["whh_b"], p["b_b"])
        return jnp.concatenate([hf, hb], axis=1)

    h_n = birnn(text_features, logical["rnn"])
    h2_n = birnn(timeline_text_features, logical["timeline_rnn"])
    means, mins, maxs = [], [], []
    start = 0
    for n in timeline_elements:
        seg = h2_n[start:start + n]
        start += n
        means.append(jnp.mean(seg, axis=0))
        mins.append(jnp.min(seg, axis=0))
        maxs.append(jnp.max(seg, axis=0))
    x = jnp.concatenate([h_n, normal_features, jnp.stack(means),
                         jnp.stack(mins), jnp.stack(maxs)], axis=1)
    x = jnp.tanh(x @ logical["fc1_w"] + logical["fc1_b"])
    x = x @ logical["fc2_w"] + logical["fc2_b"]
    return jax.nn.sigmoid(x)


if __name__ == "__main__":
    # Small shapes consistent with the module's forward (see NOTE on fc1 above).
    B = 2            # batch
    F = 8            # normal_features dim ("in_features")
    E = 16           # embedding_size
    H = 32           # rnn_hidden_size (bidirectional -> 2H per RNN output)
    HID = 32         # hidden_size of fc1
    OUT = 1          # out_features
    T = 16           # text sequence length
    T2 = 8           # timeline text sequence length
    timeline_elements = [3, 5]
    n_total = sum(timeline_elements)
    d_in = 2 * H + F + 3 * (2 * H)   # concat width actually required by forward

    key = jax.random.PRNGKey(0)
    (k_rnn, k_trnn, k_fc1w, k_fc1b, k_fc2w, k_fc2b,
     k_nf, k_tf, k_ttf) = jax.random.split(key, 9)

    logical = {
        "rnn": make_rnn_params(k_rnn, E, H),
        "timeline_rnn": make_rnn_params(k_trnn, E, H),
        "fc1_w": jax.random.uniform(k_fc1w, (d_in, HID), jnp.float32, -0.1, 0.1),
        "fc1_b": jax.random.uniform(k_fc1b, (1, HID), jnp.float32, -0.1, 0.1),
        "fc2_w": jax.random.uniform(k_fc2w, (HID, OUT), jnp.float32, -0.1, 0.1),
        "fc2_b": jax.random.uniform(k_fc2b, (1, OUT), jnp.float32, -0.1, 0.1),
    }
    kparams = build_kernel_params(logical, in_features=F, hidden=H,
                                  out_features=OUT)

    normal_features = jax.random.normal(k_nf, (B, F), jnp.float32)
    text_features = jax.random.normal(k_tf, (B, T, E), jnp.float32)
    timeline_text_features = jax.random.normal(k_ttf, (n_total, T2, E), jnp.float32)
    timeline_offsets = jnp.concatenate(
        [jnp.zeros((1,), jnp.int32),
         jnp.cumsum(jnp.array(timeline_elements, jnp.int32))]).astype(jnp.int32)

    ref = reference_forward(logical, normal_features, text_features,
                            timeline_text_features, timeline_elements)

    # Default path: whole sequences resident in VMEM, single grid step per RNN.
    out = timeline_rnn_forward(kparams, normal_features, text_features,
                               timeline_text_features, timeline_offsets)
    out = jax.block_until_ready(out)
    assert out.shape == (B, OUT), out.shape
    err = float(jnp.max(jnp.abs(out - ref)))
    # Tolerance covers bf16 storage of x / Wih (f32 accumulation everywhere).
    assert err < 2e-2, f"resident path: max abs diff vs reference: {err}"

    # Fallback path: tiny VMEM budget forces the chunked time grid (exercises
    # the two-view x fetch, the scratch carry and pl.when init/finalize).
    out_c = timeline_rnn_forward(kparams, normal_features, text_features,
                                 timeline_text_features, timeline_offsets,
                                 input_vmem_budget_bytes=1024)
    out_c = jax.block_until_ready(out_c)
    err_c = float(jnp.max(jnp.abs(out_c - ref)))
    assert err_c < 2e-2, f"chunked path: max abs diff vs reference: {err_c}"

    print("KERNEL_OK")
</pallas_src>

<mosaic_0001>
module attributes {stable_mosaic.version = 11 : i64} {
  func.func @_rnn_last_hidden_kernel(%arg0: i32, %arg1: memref<128x16xbf16, #tpu.memory_space<vmem>>, %arg2: memref<16x128xbf16, #tpu.memory_space<vmem>>, %arg3: memref<128x128xf32, #tpu.memory_space<vmem>>, %arg4: memref<1x128xf32, #tpu.memory_space<vmem>>, %arg5: memref<8x128xf32, #tpu.memory_space<vmem>>, %arg6: memref<8x128xf32, #tpu.memory_space<vmem>>) attributes {dimension_semantics = [#tpu.dimension_semantics<arbitrary>], iteration_bounds = array<i64: 1>, scalar_prefetch = 0 : i64, scratch_operands = 1 : i64, tpu.core_type = #tpu.core_type<tc>, window_params = [{pipeline_mode = #tpu.pipeline_mode<synchronous>, transform_indices = @transform_0, window_bounds = array<i64: 128, 16>}, {pipeline_mode = #tpu.pipeline_mode<synchronous>, transform_indices = @transform_1, window_bounds = array<i64: 16, 128>}, {pipeline_mode = #tpu.pipeline_mode<synchronous>, transform_indices = @transform_2, window_bounds = array<i64: 128, 128>}, {pipeline_mode = #tpu.pipeline_mode<synchronous>, transform_indices = @transform_3, window_bounds = array<i64: 1, 128>}, {pipeline_mode = #tpu.pipeline_mode<synchronous>, transform_indices = @transform_4, window_bounds = array<i64: 8, 128>}]} {
    %c0_i32 = arith.constant 0 : i32
    %0 = arith.cmpi eq, %arg0, %c0_i32 : i32
    %1 = arith.extui %0 : i1 to i32
    %c0_i32_0 = arith.constant 0 : i32
    %2 = arith.cmpi ne, %1, %c0_i32_0 : i32
    scf.if %2 {
      %cst_30 = arith.constant 0.000000e+00 : f32
      %114 = vector.broadcast %cst_30 : f32 to vector<8x128xf32>
      %c0_31 = arith.constant 0 : index
      %c0_32 = arith.constant 0 : index
      %115 = vector.load %arg6[%c0_31, %c0_32] : memref<8x128xf32, #tpu.memory_space<vmem>>, vector<8x128xf32>
      tpu.vector_store %arg6[%c0_31, %c0_32], %114 {strides = array<i32>} : memref<8x128xf32, #tpu.memory_space<vmem>>, vector<8x128xf32>,
    } else {
    }
    %c0 = arith.constant 0 : index
    %c0_1 = arith.constant 0 : index
    %3 = vector.load %arg2[%c0, %c0_1] : memref<16x128xbf16, #tpu.memory_space<vmem>>, vector<16x128xbf16>
    %c0_2 = arith.constant 0 : index
    %c0_3 = arith.constant 0 : index
    %4 = vector.load %arg4[%c0_2, %c0_3] : memref<1x128xf32, #tpu.memory_space<vmem>>, vector<1x128xf32>
    %c0_4 = arith.constant 0 : index
    %c0_5 = arith.constant 0 : index
    %5 = vector.load %arg1[%c0_4, %c0_5] : memref<128x16xbf16, #tpu.memory_space<vmem>>, vector<128x16xbf16>
    %cst = arith.constant dense<0.000000e+00> : vector<128x128xf32>
    %6 = tpu.matmul %5, %3, %cst {dimension_numbers = #tpu.dot_dimension_numbers<[1], [0], [0], [1], [0, 0, 1, 1], [], []>} : vector<128x16xbf16>, vector<16x128xbf16>, vector<128x128xf32> -> vector<128x128xf32>
    %7 = vector.broadcast %4 : vector<1x128xf32> to vector<128x128xf32>
    %8 = arith.addf %6, %7 : vector<128x128xf32>
    %9 = tpu.iota {dimensions = array<i32: 1>} : vector<8x128xi32>
    %c32_i32 = arith.constant 32 : i32
    %10 = vector.broadcast %c32_i32 : i32 to vector<8x128xi32>
    %11 = arith.cmpi slt, %9, %10 : vector<8x128xi32>
    %c0_6 = arith.constant 0 : index
    %c0_7 = arith.constant 0 : index
    %12 = vector.load %arg3[%c0_6, %c0_7] : memref<128x128xf32, #tpu.memory_space<vmem>>, vector<128x128xf32>
    %c0_8 = arith.constant 0 : index
    %c0_9 = arith.constant 0 : index
    %13 = vector.load %arg6[%c0_8, %c0_9] : memref<8x128xf32, #tpu.memory_space<vmem>>, vector<8x128xf32>
    %14 = vector.extract_strided_slice %8 {offsets = [0, 0], sizes = [8, 128], strides = [1, 1]} : vector<128x128xf32> to vector<8x128xf32>
    %15 = vector.extract_strided_slice %8 {offsets = [120, 0], sizes = [8, 128], strides = [1, 1]} : vector<128x128xf32> to vector<8x128xf32>
    %16 = arith.select %11, %14, %15 : vector<8x128xi1>, vector<8x128xf32>
    %cst_10 = arith.constant dense<0.000000e+00> : vector<8x128xf32>
    %17 = tpu.matmul %13, %12, %cst_10 {dimension_numbers = #tpu.dot_dimension_numbers<[1], [0], [0], [1], [0, 0, 1, 1], [], []>} : vector<8x128xf32>, vector<128x128xf32>, vector<8x128xf32> -> vector<8x128xf32>
    %18 = arith.addf %17, %16 : vector<8x128xf32>
    %19 = math.tanh %18 : vector<8x128xf32>
    %20 = vector.extract_strided_slice %8 {offsets = [8, 0], sizes = [8, 128], strides = [1, 1]} : vector<128x128xf32> to vector<8x128xf32>
    %21 = vector.extract_strided_slice %8 {offsets = [112, 0], sizes = [8, 128], strides = [1, 1]} : vector<128x128xf32> to vector<8x128xf32>
    %22 = arith.select %11, %20, %21 : vector<8x128xi1>, vector<8x128xf32>
    %cst_11 = arith.constant dense<0.000000e+00> : vector<8x128xf32>
    %23 = tpu.matmul %19, %12, %cst_11 {dimension_numbers = #tpu.dot_dimension_numbers<[1], [0], [0], [1], [0, 0, 1, 1], [], []>} : vector<8x128xf32>, vector<128x128xf32>, vector<8x128xf32> -> vector<8x128xf32>
    %24 = arith.addf %23, %22 : vector<8x128xf32>
    %25 = math.tanh %24 : vector<8x128xf32>
    %26 = vector.extract_strided_slice %8 {offsets = [16, 0], sizes = [8, 128], strides = [1, 1]} : vector<128x128xf32> to vector<8x128xf32>
    %27 = vector.extract_strided_slice %8 {offsets = [104, 0], sizes = [8, 128], strides = [1, 1]} : vector<128x128xf32> to vector<8x128xf32>
    %28 = arith.select %11, %26, %27 : vector<8x128xi1>, vector<8x128xf32>
    %cst_12 = arith.constant dense<0.000000e+00> : vector<8x128xf32>
    %29 = tpu.matmul %25, %12, %cst_12 {dimension_numbers = #tpu.dot_dimension_numbers<[1], [0], [0], [1], [0, 0, 1, 1], [], []>} : vector<8x128xf32>, vector<128x128xf32>, vector<8x128xf32> -> vector<8x128xf32>
    %30 = arith.addf %29, %28 : vector<8x128xf32>
    %31 = math.tanh %30 : vector<8x128xf32>
    %32 = vector.extract_strided_slice %8 {offsets = [24, 0], sizes = [8, 128], strides = [1, 1]} : vector<128x128xf32> to vector<8x128xf32>
    %33 = vector.extract_strided_slice %8 {offsets = [96, 0], sizes = [8, 128], strides = [1, 1]} : vector<128x128xf32> to vector<8x128xf32>
    %34 = arith.select %11, %32, %33 : vector<8x128xi1>, vector<8x128xf32>
    %cst_13 = arith.constant dense<0.000000e+00> : vector<8x128xf32>
    %35 = tpu.matmul %31, %12, %cst_13 {dimension_numbers = #tpu.dot_dimension_numbers<[1], [0], [0], [1], [0, 0, 1, 1], [], []>} : vector<8x128xf32>, vector<128x128xf32>, vector<8x128xf32> -> vector<8x128xf32>
    %36 = arith.addf %35, %34 : vector<8x128xf32>
    %37 = math.tanh %36 : vector<8x128xf32>
    %38 = vector.extract_strided_slice %8 {offsets = [32, 0], sizes = [8, 128], strides = [1, 1]} : vector<128x128xf32> to vector<8x128xf32>
    %39 = vector.extract_strided_slice %8 {offsets = [88, 0], sizes = [8, 128], strides = [1, 1]} : vector<128x128xf32> to vector<8x128xf32>
    %40 = arith.select %11, %38, %39 : vector<8x128xi1>, vector<8x128xf32>
    %cst_14 = arith.constant dense<0.000000e+00> : vector<8x128xf32>
    %41 = tpu.matmul %37, %12, %cst_14 {dimension_numbers = #tpu.dot_dimension_numbers<[1], [0], [0], [1], [0, 0, 1, 1], [], []>} : vector<8x128xf32>, vector<128x128xf32>, vector<8x128xf32> -> vector<8x128xf32>
    %42 = arith.addf %41, %40 : vector<8x128xf32>
    %43 = math.tanh %42 : vector<8x128xf32>
    %44 = vector.extract_strided_slice %8 {offsets = [40, 0], sizes = [8, 128], strides = [1, 1]} : vector<128x128xf32> to vector<8x128xf32>
    %45 = vector.extract_strided_slice %8 {offsets = [80, 0], sizes = [8, 128], strides = [1, 1]} : vector<128x128xf32> to vector<8x128xf32>
    %46 = arith.select %11, %44, %45 : vector<8x128xi1>, vector<8x128xf32>
    %cst_15 = arith.constant dense<0.000000e+00> : vector<8x128xf32>
    %47 = tpu.matmul %43, %12, %cst_15 {dimension_numbers = #tpu.dot_dimension_numbers<[1], [0], [0], [1], [0, 0, 1, 1], [], []>} : vector<8x128xf32>, vector<128x128xf32>, vector<8x128xf32> -> vector<8x128xf32>
    %48 = arith.addf %47, %46 : vector<8x128xf32>
    %49 = math.tanh %48 : vector<8x128xf32>
    %50 = vector.extract_strided_slice %8 {offsets = [48, 0], sizes = [8, 128], strides = [1, 1]} : vector<128x128xf32> to vector<8x128xf32>
    %51 = vector.extract_strided_slice %8 {offsets = [72, 0], sizes = [8, 128], strides = [1, 1]} : vector<128x128xf32> to vector<8x128xf32>
    %52 = arith.select %11, %50, %51 : vector<8x128xi1>, vector<8x128xf32>
    %cst_16 = arith.constant dense<0.000000e+00> : vector<8x128xf32>
    %53 = tpu.matmul %49, %12, %cst_16 {dimension_numbers = #tpu.dot_dimension_numbers<[1], [0], [0], [1], [0, 0, 1, 1], [], []>} : vector<8x128xf32>, vector<128x128xf32>, vector<8x128xf32> -> vector<8x128xf32>
    %54 = arith.addf %53, %52 : vector<8x128xf32>
    %55 = math.tanh %54 : vector<8x128xf32>
    %56 = vector.extract_strided_slice %8 {offsets = [56, 0], sizes = [8, 128], strides = [1, 1]} : vector<128x128xf32> to vector<8x128xf32>
    %57 = vector.extract_strided_slice %8 {offsets = [64, 0], sizes = [8, 128], strides = [1, 1]} : vector<128x128xf32> to vector<8x128xf32>
    %58 = arith.select %11, %56, %57 : vector<8x128xi1>, vector<8x128xf32>
    %cst_17 = arith.constant dense<0.000000e+00> : vector<8x128xf32>
    %59 = tpu.matmul %55, %12, %cst_17 {dimension_numbers = #tpu.dot_dimension_numbers<[1], [0], [0], [1], [0, 0, 1, 1], [], []>} : vector<8x128xf32>, vector<128x128xf32>, vector<8x128xf32> -> vector<8x128xf32>
    %60 = arith.addf %59, %58 : vector<8x128xf32>
    %61 = math.tanh %60 : vector<8x128xf32>
    %62 = vector.extract_strided_slice %8 {offsets = [64, 0], sizes = [8, 128], strides = [1, 1]} : vector<128x128xf32> to vector<8x128xf32>
    %63 = vector.extract_strided_slice %8 {offsets = [56, 0], sizes = [8, 128], strides = [1, 1]} : vector<128x128xf32> to vector<8x128xf32>
    %64 = arith.select %11, %62, %63 : vector<8x128xi1>, vector<8x128xf32>
    %cst_18 = arith.constant dense<0.000000e+00> : vector<8x128xf32>
    %65 = tpu.matmul %61, %12, %cst_18 {dimension_numbers = #tpu.dot_dimension_numbers<[1], [0], [0], [1], [0, 0, 1, 1], [], []>} : vector<8x128xf32>, vector<128x128xf32>, vector<8x128xf32> -> vector<8x128xf32>
    %66 = arith.addf %65, %64 : vector<8x128xf32>
    %67 = math.tanh %66 : vector<8x128xf32>
    %68 = vector.extract_strided_slice %8 {offsets = [72, 0], sizes = [8, 128], strides = [1, 1]} : vector<128x128xf32> to vector<8x128xf32>
    %69 = vector.extract_strided_slice %8 {offsets = [48, 0], sizes = [8, 128], strides = [1, 1]} : vector<128x128xf32> to vector<8x128xf32>
    %70 = arith.select %11, %68, %69 : vector<8x128xi1>, vector<8x128xf32>
    %cst_19 = arith.constant dense<0.000000e+00> : vector<8x128xf32>
    %71 = tpu.matmul %67, %12, %cst_19 {dimension_numbers = #tpu.dot_dimension_numbers<[1], [0], [0], [1], [0, 0, 1, 1], [], []>} : vector<8x128xf32>, vector<128x128xf32>, vector<8x128xf32> -> vector<8x128xf32>
    %72 = arith.addf %71, %70 : vector<8x128xf32>
    %73 = math.tanh %72 : vector<8x128xf32>
    %74 = vector.extract_strided_slice %8 {offsets = [80, 0], sizes = [8, 128], strides = [1, 1]} : vector<128x128xf32> to vector<8x128xf32>
    %75 = vector.extract_strided_slice %8 {offsets = [40, 0], sizes = [8, 128], strides = [1, 1]} : vector<128x128xf32> to vector<8x128xf32>
    %76 = arith.select %11, %74, %75 : vector<8x128xi1>, vector<8x128xf32>
    %cst_20 = arith.constant dense<0.000000e+00> : vector<8x128xf32>
    %77 = tpu.matmul %73, %12, %cst_20 {dimension_numbers = #tpu.dot_dimension_numbers<[1], [0], [0], [1], [0, 0, 1, 1], [], []>} : vector<8x128xf32>, vector<128x128xf32>, vector<8x128xf32> -> vector<8x128xf32>
    %78 = arith.addf %77, %76 : vector<8x128xf32>
    %79 = math.tanh %78 : vector<8x128xf32>
    %80 = vector.extract_strided_slice %8 {offsets = [88, 0], sizes = [8, 128], strides = [1, 1]} : vector<128x128xf32> to vector<8x128xf32>
    %81 = vector.extract_strided_slice %8 {offsets = [32, 0], sizes = [8, 128], strides = [1, 1]} : vector<128x128xf32> to vector<8x128xf32>
    %82 = arith.select %11, %80, %81 : vector<8x128xi1>, vector<8x128xf32>
    %cst_21 = arith.constant dense<0.000000e+00> : vector<8x128xf32>
    %83 = tpu.matmul %79, %12, %cst_21 {dimension_numbers = #tpu.dot_dimension_numbers<[1], [0], [0], [1], [0, 0, 1, 1], [], []>} : vector<8x128xf32>, vector<128x128xf32>, vector<8x128xf32> -> vector<8x128xf32>
    %84 = arith.addf %83, %82 : vector<8x128xf32>
    %85 = math.tanh %84 : vector<8x128xf32>
    %86 = vector.extract_strided_slice %8 {offsets = [96, 0], sizes = [8, 128], strides = [1, 1]} : vector<128x128xf32> to vector<8x128xf32>
    %87 = vector.extract_strided_slice %8 {offsets = [24, 0], sizes = [8, 128], strides = [1, 1]} : vector<128x128xf32> to vector<8x128xf32>
    %88 = arith.select %11, %86, %87 : vector<8x128xi1>, vector<8x128xf32>
    %cst_22 = arith.constant dense<0.000000e+00> : vector<8x128xf32>
    %89 = tpu.matmul %85, %12, %cst_22 {dimension_numbers = #tpu.dot_dimension_numbers<[1], [0], [0], [1], [0, 0, 1, 1], [], []>} : vector<8x128xf32>, vector<128x128xf32>, vector<8x128xf32> -> vector<8x128xf32>
    %90 = arith.addf %89, %88 : vector<8x128xf32>
    %91 = math.tanh %90 : vector<8x128xf32>
    %92 = vector.extract_strided_slice %8 {offsets = [104, 0], sizes = [8, 128], strides = [1, 1]} : vector<128x128xf32> to vector<8x128xf32>
    %93 = vector.extract_strided_slice %8 {offsets = [16, 0], sizes = [8, 128], strides = [1, 1]} : vector<128x128xf32> to vector<8x128xf32>
    %94 = arith.select %11, %92, %93 : vector<8x128xi1>, vector<8x128xf32>
    %cst_23 = arith.constant dense<0.000000e+00> : vector<8x128xf32>
    %95 = tpu.matmul %91, %12, %cst_23 {dimension_numbers = #tpu.dot_dimension_numbers<[1], [0], [0], [1], [0, 0, 1, 1], [], []>} : vector<8x128xf32>, vector<128x128xf32>, vector<8x128xf32> -> vector<8x128xf32>
    %96 = arith.addf %95, %94 : vector<8x128xf32>
    %97 = math.tanh %96 : vector<8x128xf32>
    %98 = vector.extract_strided_slice %8 {offsets = [112, 0], sizes = [8, 128], strides = [1, 1]} : vector<128x128xf32> to vector<8x128xf32>
    %99 = vector.extract_strided_slice %8 {offsets = [8, 0], sizes = [8, 128], strides = [1, 1]} : vector<128x128xf32> to vector<8x128xf32>
    %100 = arith.select %11, %98, %99 : vector<8x128xi1>, vector<8x128xf32>
    %cst_24 = arith.constant dense<0.000000e+00> : vector<8x128xf32>
    %101 = tpu.matmul %97, %12, %cst_24 {dimension_numbers = #tpu.dot_dimension_numbers<[1], [0], [0], [1], [0, 0, 1, 1], [], []>} : vector<8x128xf32>, vector<128x128xf32>, vector<8x128xf32> -> vector<8x128xf32>
    %102 = arith.addf %101, %100 : vector<8x128xf32>
    %103 = math.tanh %102 : vector<8x128xf32>
    %104 = vector.extract_strided_slice %8 {offsets = [120, 0], sizes = [8, 128], strides = [1, 1]} : vector<128x128xf32> to vector<8x128xf32>
    %105 = vector.extract_strided_slice %8 {offsets = [0, 0], sizes = [8, 128], strides = [1, 1]} : vector<128x128xf32> to vector<8x128xf32>
    %106 = arith.select %11, %104, %105 : vector<8x128xi1>, vector<8x128xf32>
    %cst_25 = arith.constant dense<0.000000e+00> : vector<8x128xf32>
    %107 = tpu.matmul %103, %12, %cst_25 {dimension_numbers = #tpu.dot_dimension_numbers<[1], [0], [0], [1], [0, 0, 1, 1], [], []>} : vector<8x128xf32>, vector<128x128xf32>, vector<8x128xf32> -> vector<8x128xf32>
    %108 = arith.addf %107, %106 : vector<8x128xf32>
    %109 = math.tanh %108 : vector<8x128xf32>
    %c0_26 = arith.constant 0 : index
    %c0_27 = arith.constant 0 : index
    %110 = vector.load %arg6[%c0_26, %c0_27] : memref<8x128xf32, #tpu.memory_space<vmem>>, vector<8x128xf32>
    tpu.vector_store %arg6[%c0_26, %c0_27], %109 {strides = array<i32>} : memref<8x128xf32, #tpu.memory_space<vmem>>, vector<8x128xf32>,
    %c0_i32_28 = arith.constant 0 : i32
    %111 = arith.cmpi eq, %arg0, %c0_i32_28 : i32
    %112 = arith.extui %111 : i1 to i32
    %c0_i32_29 = arith.constant 0 : i32
    %113 = arith.cmpi ne, %112, %c0_i32_29 : i32
    scf.if %113 {
      %c0_30 = arith.constant 0 : index
      %c0_31 = arith.constant 0 : index
      %114 = vector.load %arg6[%c0_30, %c0_31] : memref<8x128xf32, #tpu.memory_space<vmem>>, vector<8x128xf32>
      %c0_32 = arith.constant 0 : index
      %c0_33 = arith.constant 0 : index
      %115 = vector.load %arg5[%c0_32, %c0_33] : memref<8x128xf32, #tpu.memory_space<vmem>>, vector<8x128xf32>
      tpu.vector_store %arg5[%c0_32, %c0_33], %114 {strides = array<i32>} : memref<8x128xf32, #tpu.memory_space<vmem>>, vector<8x128xf32>,
    } else {
    }
    return
  }
  func.func @transform_0(%arg0: i32) -> (i32, i32) {
    %c0_i32 = arith.constant 0 : i32
    %c0_i32_0 = arith.constant 0 : i32
    %c0_i32_1 = arith.constant 0 : i32
    return %c0_i32, %c0_i32_0 : i32, i32
  }
  func.func @transform_1(%arg0: i32) -> (i32, i32) {
    %c0_i32 = arith.constant 0 : i32
    %c0_i32_0 = arith.constant 0 : i32
    %c0_i32_1 = arith.constant 0 : i32
    return %c0_i32, %c0_i32_0 : i32, i32
  }
  func.func @transform_2(%arg0: i32) -> (i32, i32) {
    %c0_i32 = arith.constant 0 : i32
    %c0_i32_0 = arith.constant 0 : i32
    %c0_i32_1 = arith.constant 0 : i32
    return %c0_i32, %c0_i32_0 : i32, i32
  }
  func.func @transform_3(%arg0: i32) -> (i32, i32) {
    %c0_i32 = arith.constant 0 : i32
    %c0_i32_0 = arith.constant 0 : i32
    %c0_i32_1 = arith.constant 0 : i32
    return %c0_i32, %c0_i32_0 : i32, i32
  }
  func.func @transform_4(%arg0: i32) -> (i32, i32) {
    %c0_i32 = arith.constant 0 : i32
    %c0_i32_0 = arith.constant 0 : i32
    %c0_i32_1 = arith.constant 0 : i32
    return %c0_i32, %c0_i32_0 : i32, i32
  }
}

</mosaic_0001>

<bundles_post_ra>
// kernel: tpu_custom_call.1
= control target key start
LH: loop header
LB: loop body
LE: loop exit
PB: predicated region body
PF: predicated region fallthrough
CT: control target
= control target key end

     0   :  { %9 = vsyncpa [#allocation4], 0  ;;  %s3150_s0 = inlined_call_operand.vmem [shape: bf16[128,16], index: 0, kind: input, shape index: {}]   ;;  %s3151_s1 = inlined_call_operand.vmem [shape: bf16[16,128], index: 1, kind: input, shape index: {}]   ;;  %s3152_s2 = inlined_call_operand.hbm [shape: f32[128,128], index: 2, kind: input, shape index: {}]   ;;  %s3153_s3 = inlined_call_operand.vmem [shape: f32[1,128], index: 3, kind: input, shape index: {}]   ;;  %s3154_s4 = inlined_call_operand.hbm [shape: f32[8,128], index: 4, kind: output, shape index: {}]  }
   0x1   :  { %10 = vsyncpa [#allocation5], 0  ;;  %s2408_s15 = smov [#allocation3]  }
   0x2   :  { %s20_s16 = sshll.u32 %s2408_s15, 4  ;;  %s21_s16 = int_to_ptr.vmem [resolvable:$true] %s20_s16 }
   0x3   :  { %s2372_s17 = scalar_lea.vmem %s21_s16, 2048  ;;  %p2377_p1 = scmp.lt.s32.totalorder %s21_s16, %s21_s16 }
   0x4   :  { %p2373_p0 = scmp.ne.s32.totalorder %s21_s16, %s2372_s17  ;;  %p2378_p2 = scmp.lt.s32.totalorder %s2372_s17, %s2372_s17 }
   0x6   :  { %p2379_p3 = por %p2378_p2, %p2377_p1 }
   0x8   :  { %p2380_p4 = pnand %p2379_p3, %p2373_p0 }
   0xa   :  { %2383 = shalt.err (!%p2380_p4)
}
   0xb   :  { %s2409_s18 = smov 128   ;;  %s2410_s19 = smov 8  }
   0xc   :  { %26 = dma.hbm_to_vmem [thread:$0]  %s3152_s2, 2048, %s21_s16, [#allocation4], %s2409_s18, %s2409_s18, %s2410_s19  }
   0xd   :  { %2404 = dma.done.wait [#allocation4], 2048  }
   0xe   :  { %2405 = vsyncadd [#allocation4], 4294965248  ;;  %v2411_v0 = vmov 0.0   ;;  %vm2412_vm0 = vmmov 0   ;;  %v2307_v1 = vld [vmem:[%s3151_s1] sm:$0xff]   ;;  %v2448_v2 = vld [vmem:[#allocation3 + $0x78] sm:$0xff]  ;;  %v231_v35 = vlaneseq }
   0xf   :  { %1741 = vmatprep.subr.mxu1 %v2411_v0  ;;  %1773 = vmatprep.mubr.msk.f32.mxu1 %vm2412_vm0, %v2411_v0  ;;  %vm109_vm1 = vcmask 130048   ;;  %v2308_v3 = vld [vmem:[%s3150_s0] sm:$0xff]   ;;  %v2309_v4 = vld [vmem:[%s3150_s0 + $0x8] sm:$0xff]   ;;  %v2458_v5 = vld [vmem:[#allocation3 + $0x70] sm:$0xff] }
  0x10   :  { %1723 = vmatprep.subr.bf16.mxu0 %v2307_v1  ;;  %1742 = vmatpush3.msra.mxu1 %v2448_v2  ;;  %v2460_v6 = vld [vmem:[#allocation3 + $0x68] sm:$0xff]  ;;  %v2464_v7 = vld [vmem:[#allocation3 + $0x60] sm:$0xff]  ;;  %v2310_v8 = vld [vmem:[%s3150_s0 + $0x10] sm:$0xff]   ;;  %v232_v40 = vand.u32 127, %v231_v35 }
  0x11   :  { %1724 = vmatpush3.bf16.msra.mxu0 %v2307_v1  ;;  %1743 = vmatprep.subr.mxu1 %v2411_v0  ;;  %v2474_v9 = vld [vmem:[#allocation3 + $0x58] sm:$0xff]  ;;  %v2480_v10 = vld [vmem:[#allocation3 + $0x50] sm:$0xff]  ;;  %v2487_v12 = vld [vmem:[#allocation3 + $0x48] sm:$0xff] }
  0x12   :  { %1725 = vmatprep.mubr.msk.bf16.mxu0 %vm109_vm1, %v2308_v3  ;;  %1744 = vmatpush3.msra.mxu1 %v2458_v5  ;;  %v2311_v11 = vld [vmem:[%s3150_s0 + $0x18] sm:$0xff]   ;;  %v2312_v13 = vld [vmem:[%s3150_s0 + $0x20] sm:$0xff]   ;;  %v2510_v16 = vld [vmem:[#allocation3 + $0x30] sm:$0xff]  ;;  %vm233_vm2 = vcmp.lt.s32.totalorder %v232_v40, 32 }
  0x13   :  { %1745 = vmatprep.subr.mxu1 %v2411_v0  ;;  %1776 = vmatprep.subr.mxu0 %v2411_v0  ;;  %v2498_v14 = vld [vmem:[#allocation3 + $0x40] sm:$0xff]  ;;  %v2504_v15 = vld [vmem:[#allocation3 + $0x38] sm:$0xff]  ;;  %v2313_v17 = vld [vmem:[%s3150_s0 + $0x28] sm:$0xff]  }
  0x14   :  { %1726 = vmatmul.mubr.msk.bf16.vlgmr.msra.gmra.mxu0 %vm109_vm1, %v2309_v4  ;;  %1746 = vmatpush3.msra.mxu1 %v2460_v6  ;;  %v2519_v18 = vld [vmem:[#allocation3 + $0x28] sm:$0xff]  ;;  %v2314_v19 = vld [vmem:[%s3150_s0 + $0x30] sm:$0xff]   ;;  %v2528_v20 = vld [vmem:[#allocation3 + $0x20] sm:$0xff] }
  0x15   :  { %1747 = vmatprep.subr.mxu1 %v2411_v0  ;;  %1729 = vmatprep.mubr.msk.bf16.mxu0 %vm109_vm1, %v2310_v8  ;;  %v2534_v21 = vld [vmem:[#allocation3 + $0x18] sm:$0xff]  ;;  %v2540_v22 = vld [vmem:[#allocation3 + $0x10] sm:$0xff]  ;;  %v2549_v24 = vld [vmem:[#allocation3 + $0x8] sm:$0xff] }
  0x16   :  { %1748 = vmatpush3.msra.mxu1 %v2464_v7  ;;  %1777 = vmatpush3.msra.mxu0 %v2448_v2  ;;  %v2315_v23 = vld [vmem:[%s3150_s0 + $0x38] sm:$0xff]   ;;  %v2555_v25 = vld [vmem:[#allocation3] sm:$0xff] }
  0x17   :  { %1749 = vmatprep.subr.mxu1 %v2411_v0  ;;  %1778 = vmatprep.subr.mxu0 %v2411_v0  ;;  %v1424_v26 = vld [vmem:[%s3153_s3] ss:$0 sm:$0xff]  ;;  %s2413_s3 = smov [#allocation6]  }
  0x18   :  { %1750 = vmatpush3.msra.mxu1 %v2474_v9  ;;  %1779 = vmatpush3.msra.mxu0 %v2458_v5  ;;  %s1415_s13 = sshll.u32 %s2413_s3, 4  ;;  %s1416_s13 = int_to_ptr.vmem [resolvable:$true] %s1415_s13 }
  0x19   :  { %1751 = vmatprep.subr.mxu1 %v2411_v0  ;;  %1780 = vmatprep.subr.mxu0 %v2411_v0  ;;  %s2384_s14 = scalar_lea.vmem %s1416_s13, 128  ;;  %p2389_p6 = scmp.lt.s32.totalorder %s1416_s13, %s1416_s13 }
  0x1a   :  { %1752 = vmatpush3.msra.mxu1 %v2480_v10  ;;  %1781 = vmatpush3.msra.mxu0 %v2460_v6  ;;  %p2385_p5 = scmp.ne.s32.totalorder %s1416_s13, %s2384_s14  ;;  %p2390_p7 = scmp.lt.s32.totalorder %s2384_s14, %s2384_s14 }
  0x1b   :  { %1753 = vmatprep.subr.mxu1 %v2411_v0  ;;  %1782 = vmatprep.subr.mxu0 %v2411_v0 }
  0x1c   :  { %1730 = vmatmul.mubr.msk.bf16.gmra.mxu0 %vm109_vm1, %v2311_v11  ;;  %1754 = vmatpush3.msra.mxu1 %v2487_v12  ;;  %p2391_p8 = por %p2390_p7, %p2389_p6 }
  0x1d   :  { %1755 = vmatprep.subr.mxu1 %v2411_v0  ;;  %1733 = vmatprep.mubr.msk.bf16.mxu0 %vm109_vm1, %v2312_v13 }
  0x1e   :  { %1756 = vmatpush3.msra.mxu1 %v2498_v14  ;;  %1783 = vmatpush3.msra.mxu0 %v2464_v7  ;;  %p2392_p9 = pnand %p2391_p8, %p2385_p5 }
  0x1f   :  { %1757 = vmatprep.subr.mxu1 %v2411_v0  ;;  %1784 = vmatprep.subr.mxu0 %v2411_v0 }
  0x20   :  { %1758 = vmatpush3.msra.mxu1 %v2504_v15  ;;  %1785 = vmatpush3.msra.mxu0 %v2474_v9 }
  0x21   :  { %1759 = vmatprep.subr.mxu1 %v2411_v0  ;;  %1786 = vmatprep.subr.mxu0 %v2411_v0 }
  0x22   :  { %1760 = vmatpush3.msra.mxu1 %v2510_v16  ;;  %1787 = vmatpush3.msra.mxu0 %v2480_v10 }
  0x23   :  { %1761 = vmatprep.subr.mxu1 %v2411_v0  ;;  %1788 = vmatprep.subr.mxu0 %v2411_v0 }
  0x24   :  { %1734 = vmatmul.mubr.msk.bf16.gmra.mxu0 %vm109_vm1, %v2313_v17  ;;  %1762 = vmatpush3.msra.mxu1 %v2519_v18 }
  0x25   :  { %1763 = vmatprep.subr.mxu1 %v2411_v0  ;;  %1737 = vmatprep.mubr.msk.bf16.mxu0 %vm109_vm1, %v2314_v19 }
  0x26   :  { %1764 = vmatpush3.msra.mxu1 %v2528_v20  ;;  %1789 = vmatpush3.msra.mxu0 %v2487_v12 }
  0x27   :  { %1765 = vmatprep.subr.mxu1 %v2411_v0  ;;  %1790 = vmatprep.subr.mxu0 %v2411_v0 }
  0x28   :  { %1766 = vmatpush3.msra.mxu1 %v2534_v21  ;;  %1791 = vmatpush3.msra.mxu0 %v2498_v14 }
  0x29   :  { %1767 = vmatprep.subr.mxu1 %v2411_v0  ;;  %1792 = vmatprep.subr.mxu0 %v2411_v0 }
  0x2a   :  { %1768 = vmatpush3.msra.mxu1 %v2540_v22  ;;  %1793 = vmatpush3.msra.mxu0 %v2504_v15 }
  0x2b   :  { %1769 = vmatprep.subr.mxu1 %v2411_v0  ;;  %1794 = vmatprep.subr.mxu0 %v2411_v0 }
  0x2c   :  { %1738 = vmatmul.mubr.msk.bf16.gmra.mxu0 %vm109_vm1, %v2315_v23  ;;  %1770 = vmatpush3.msra.mxu1 %v2549_v24 }
  0x2d   :  { %1771 = vmatprep.subr.mxu1 %v2411_v0  ;;  %1795 = vmatpush3.msra.mxu0 %v2510_v16 }
  0x2e   :  { %1772 = vmatpush3.msra.mxu1 %v2555_v25  ;;  %1796 = vmatprep.subr.mxu0 %v2411_v0 }
  0x2f   :  { %1774 = vmatmul.mubr.f32.vlgmr.msra.gmra.mxu1 %v2411_v0  ;;  %1797 = vmatpush3.msra.mxu0 %v2519_v18 }
  0x30   :  { %1798 = vmatprep.subr.mxu0 %v2411_v0  ;;  %1808 = vmatprep.mubr.msk.f32.mxu0 %vm2412_vm0, %v2411_v0 }
  0x31   :  { %1799 = vmatpush3.msra.mxu0 %v2528_v20  ;;  %1811 = vmatprep.subr.mxu1 %v2411_v0 }
  0x32   :  { %1800 = vmatprep.subr.mxu0 %v2411_v0  ;;  %1812 = vmatpush3.msra.mxu1 %v2448_v2 }
  0x33   :  { %1801 = vmatpush3.msra.mxu0 %v2534_v21  ;;  %1813 = vmatprep.subr.mxu1 %v2411_v0 }
  0x34   :  { %1802 = vmatprep.subr.mxu0 %v2411_v0  ;;  %1814 = vmatpush3.msra.mxu1 %v2458_v5 }
  0x35   :  { %1803 = vmatpush3.msra.mxu0 %v2540_v22  ;;  %1815 = vmatprep.subr.mxu1 %v2411_v0 }
  0x36   :  { %1804 = vmatprep.subr.mxu0 %v2411_v0  ;;  %1816 = vmatpush3.msra.mxu1 %v2460_v6 }
  0x37   :  { %1805 = vmatpush3.msra.mxu0 %v2549_v24  ;;  %1817 = vmatprep.subr.mxu1 %v2411_v0 }
  0x38   :  { %1806 = vmatprep.subr.mxu0 %v2411_v0  ;;  %1818 = vmatpush3.msra.mxu1 %v2464_v7 }
  0x39   :  { %1807 = vmatpush3.msra.mxu0 %v2555_v25  ;;  %1819 = vmatprep.subr.mxu1 %v2411_v0 }
  0x3a   :  { %1820 = vmatpush3.msra.mxu1 %v2474_v9  ;;  %1843 = vmatprep.mubr.msk.f32.mxu1 %vm2412_vm0, %v2411_v0 }
  0x3b   :  { %1821 = vmatprep.subr.mxu1 %v2411_v0  ;;  %1846 = vmatprep.subr.mxu0 %v2411_v0 }
  0x3c   :  { %1822 = vmatpush3.msra.mxu1 %v2480_v10 }
  0x3d   :  { %1823 = vmatprep.subr.mxu1 %v2411_v0 }
  0x3e   :  { %1824 = vmatpush3.msra.mxu1 %v2487_v12 }
  0x3f   :  { %1825 = vmatprep.subr.mxu1 %v2411_v0 }
  0x40   :  { %1826 = vmatpush3.msra.mxu1 %v2498_v14 }
  0x41   :  { %1827 = vmatprep.subr.mxu1 %v2411_v0 }
  0x42   :  { %1828 = vmatpush3.msra.mxu1 %v2504_v15 }
  0x43   :  { %1829 = vmatprep.subr.mxu1 %v2411_v0 }
  0x44   :  { %1830 = vmatpush3.msra.mxu1 %v2510_v16 }
  0x45   :  { %1831 = vmatprep.subr.mxu1 %v2411_v0 }
  0x46   :  { %1832 = vmatpush3.msra.mxu1 %v2519_v18 }
  0x47   :  { %1833 = vmatprep.subr.mxu1 %v2411_v0 }
  0x48   :  { %1834 = vmatpush3.msra.mxu1 %v2528_v20 }
  0x49   :  { %1835 = vmatprep.subr.mxu1 %v2411_v0 }
  0x4a   :  { %1836 = vmatpush3.msra.mxu1 %v2534_v21 }
  0x4b   :  { %1837 = vmatprep.subr.mxu1 %v2411_v0 }
  0x4c   :  { %1838 = vmatpush3.msra.mxu1 %v2540_v22 }
  0x4d   :  { %1839 = vmatprep.subr.mxu1 %v2411_v0 }
  0x4e   :  { %1840 = vmatpush3.msra.mxu1 %v2549_v24 }
  0x4f   :  { %1841 = vmatprep.subr.mxu1 %v2411_v0 }
  0x50   :  { %1842 = vmatpush3.msra.mxu1 %v2555_v25 }
  0x51   :  { %1881 = vmatprep.subr.mxu1 %v2411_v0 }
  0xd4   :  { %v1727_v27 = vpop.f32.mrf.mxu0 }
  0xd5   :  { %v177_v28 = vadd.f32 %v1727_v27, %v1424_v26 }
  0xd6   :  { %v168_v29 = vpop.f32.mrf.mxu0 }
  0xd7   :  { %v169_v11 = vadd.f32 %v1424_v26, %v168_v29 }
  0xd8   :  { %v1728_v30 = vpop.f32.mrf.mxu0 }
  0xd9   :  { %v180_v31 = vadd.f32 %v1728_v30, %v1424_v26 }
  0xda   :  { %v171_v32 = vpop.f32.mrf.mxu0 }
  0xdb   :  { %v172_v33 = vadd.f32 %v1424_v26, %v171_v32 }
  0xdc   :  { %v1731_v34 = vpop.f32.mrf.mxu0 }
  0xdd   :  { %v193_v36 = vadd.f32 %v1731_v34, %v1424_v26 }
  0xde   :  { %v184_v37 = vpop.f32.mrf.mxu0 }
  0xdf   :  { %v185_v38 = vadd.f32 %v1424_v26, %v184_v37 }
  0xe0   :  { %v1732_v39 = vpop.f32.mrf.mxu0 }
  0xe1   :  { %v196_v41 = vadd.f32 %v1732_v39, %v1424_v26 }
  0xe2   :  { %v187_v42 = vpop.f32.mrf.mxu0 }
  0xe3   :  { %v188_v43 = vadd.f32 %v1424_v26, %v187_v42 }
  0xe4   :  { %v1735_v44 = vpop.f32.mrf.mxu0 }
  0xe5   :  { %v209_v45 = vadd.f32 %v1735_v44, %v1424_v26 }
  0xe6   :  { %v200_v46 = vpop.f32.mrf.mxu0 }
  0xe7   :  { %v201_v47 = vadd.f32 %v1424_v26, %v200_v46  ;;  %v2618_v48 = vsel %vm233_vm2, %v188_v43, %v209_v45  ;;  %v2621_v49 = vsel %vm233_vm2, %v209_v45, %v188_v43 }
  0xe8   :  { %v1736_v50 = vpop.f32.mrf.mxu0 }
  0xe9   :  { %v212_v51 = vadd.f32 %v1736_v50, %v1424_v26  ;;  %v2624_v52 = vsel %vm233_vm2, %v196_v41, %v201_v47  ;;  %v2627_v53 = vsel %vm233_vm2, %v201_v47, %v196_v41 }
  0xea   :  { %v203_v54 = vpop.f32.mrf.mxu0 }
  0xeb   :  { %v204_v55 = vadd.f32 %v1424_v26, %v203_v54  ;;  %v2630_v56 = vsel %vm233_vm2, %v185_v38, %v212_v51  ;;  %v2633_v57 = vsel %vm233_vm2, %v212_v51, %v185_v38 }
  0xec   :  { %v1739_v58 = vpop.f32.mrf.mxu0 }
  0xed   :  { %v225_v59 = vadd.f32 %v1739_v58, %v1424_v26  ;;  %v2636_v60 = vsel %vm233_vm2, %v193_v36, %v204_v55  ;;  %v2639_v61 = vsel %vm233_vm2, %v204_v55, %v193_v36 }
  0xee   :  { %v216_v62 = vpop.f32.mrf.mxu0 }
  0xef   :  { %v217_v63 = vadd.f32 %v1424_v26, %v216_v62  ;;  %v318_v1 = vpop.f32.mrf.mxu1  ;;  %v323_v3 = vsel %vm233_vm2, %v172_v33, %v225_v59  ;;  %v2643_v4 = vsel %vm233_vm2, %v225_v59, %v172_v33 }
  0xf0   :  { %v1740_v8 = vpop.f32.mrf.mxu0 }
  0xf1   :  { %v228_v13 = vadd.f32 %v1740_v8, %v1424_v26  ;;  %v1775_v17 = vpop.f32.mrf.mxu1  ;;  %v2646_v19 = vsel %vm233_vm2, %v180_v31, %v217_v63  ;;  %v2649_v23 = vsel %vm233_vm2, %v217_v63, %v180_v31 }
  0xf2   :  { %v219_v27 = vpop.f32.mrf.mxu0  ;;  %v3009_v17 = vld [vmem:[#allocation3 + $0x38] sm:$0xff] }
  0xf3   :  { %v251_v30 = vsel %vm233_vm2, %v169_v11, %v228_v13  ;;  %v220_v32 = vadd.f32 %v1424_v26, %v219_v27  ;;  %v2653_v34 = vsel %vm233_vm2, %v228_v13, %v169_v11  ;;  %v2946_v11 = vld [vmem:[#allocation3 + $0x70] sm:$0xff]  ;;  %v2954_v13 = vld [vmem:[#allocation3 + $0x60] sm:$0xff]  ;;  %v3017_v27 = vld [vmem:[#allocation3 + $0x28] sm:$0xff] }
  0xf4   :  { %v319_v35 = vadd.f32 %v318_v1, %v251_v30 }
  0xf5   :  { %v2656_v33 = vsel %vm233_vm2, %v177_v28, %v220_v32  ;;  %v2659_v29 = vsel %vm233_vm2, %v220_v32, %v177_v28 }
  0xf6   :  { %2316 = vtanh.f32 %v319_v35  ;;  %v3072_v35 = vld [vmem:[#allocation3] sm:$0xff] }
 0x103   :  { %v2317_v36 = vpop.eup %2316 }
 0x104   :  { %1809 = vmatmul.mubr.f32.vlgmr.msra.gmra.mxu0 %v2317_v36 }
 0x105   :  { %1847 = vmatpush3.msra.mxu0 %v2448_v2  ;;  %1878 = vmatprep.mubr.msk.f32.mxu0 %vm2412_vm0, %v2411_v0 }
 0x106   :  { %1848 = vmatprep.subr.mxu0 %v2411_v0 }
 0x107   :  { %1849 = vmatpush3.msra.mxu0 %v2458_v5 }
 0x108   :  { %1850 = vmatprep.subr.mxu0 %v2411_v0 }
 0x109   :  { %1851 = vmatpush3.msra.mxu0 %v2460_v6 }
 0x10a   :  { %1852 = vmatprep.subr.mxu0 %v2411_v0 }
 0x10b   :  { %1853 = vmatpush3.msra.mxu0 %v2464_v7 }
 0x10c   :  { %1854 = vmatprep.subr.mxu0 %v2411_v0 }
 0x10d   :  { %1855 = vmatpush3.msra.mxu0 %v2474_v9 }
 0x10e   :  { %1856 = vmatprep.subr.mxu0 %v2411_v0 }
 0x10f   :  { %1857 = vmatpush3.msra.mxu0 %v2480_v10 }
 0x110   :  { %1858 = vmatprep.subr.mxu0 %v2411_v0 }
 0x111   :  { %1859 = vmatpush3.msra.mxu0 %v2487_v12 }
 0x112   :  { %1860 = vmatprep.subr.mxu0 %v2411_v0 }
 0x113   :  { %1861 = vmatpush3.msra.mxu0 %v2498_v14 }
 0x114   :  { %1862 = vmatprep.subr.mxu0 %v2411_v0 }
 0x115   :  { %1863 = vmatpush3.msra.mxu0 %v2504_v15 }
 0x116   :  { %1864 = vmatprep.subr.mxu0 %v2411_v0 }
 0x117   :  { %1865 = vmatpush3.msra.mxu0 %v2510_v16 }
 0x118   :  { %1866 = vmatprep.subr.mxu0 %v2411_v0 }
 0x119   :  { %1867 = vmatpush3.msra.mxu0 %v2519_v18 }
 0x11a   :  { %1868 = vmatprep.subr.mxu0 %v2411_v0 }
 0x11b   :  { %1869 = vmatpush3.msra.mxu0 %v2528_v20 }
 0x11c   :  { %1870 = vmatprep.subr.mxu0 %v2411_v0 }
 0x11d   :  { %1871 = vmatpush3.msra.mxu0 %v2534_v21 }
 0x11e   :  { %1872 = vmatprep.subr.mxu0 %v2411_v0 }
 0x11f   :  { %1873 = vmatpush3.msra.mxu0 %v2540_v22 }
 0x120   :  { %1874 = vmatprep.subr.mxu0 %v2411_v0 }
 0x121   :  { %1875 = vmatpush3.msra.mxu0 %v2549_v24 }
 0x122   :  { %1876 = vmatprep.subr.mxu0 %v2411_v0 }
 0x123   :  { %1877 = vmatpush3.msra.mxu0 %v2555_v25 }
 0x124   :  { %1916 = vmatprep.subr.mxu0 %v2411_v0 }
 0x1c4   :  { %v390_v26 = vpop.f32.mrf.mxu0 }
 0x1c5   :  { %v391_v28 = vadd.f32 %v390_v26, %v323_v3 }
 0x1c6   :  { %v1810_v31 = vpop.f32.mrf.mxu0 }
 0x1c7   :  { %2318 = vtanh.f32 %v391_v28 }
 0x1d4   :  { %v2319_v37 = vpop.eup %2318 }
 0x1d5   :  { %1844 = vmatmul.mubr.f32.vlgmr.msra.gmra.mxu1 %v2319_v37 }
 0x1d6   :  { %1882 = vmatpush3.msra.mxu1 %v2448_v2  ;;  %1913 = vmatprep.mubr.msk.f32.mxu1 %vm2412_vm0, %v2411_v0 }
 0x1d7   :  { %1883 = vmatprep.subr.mxu1 %v2411_v0 }
 0x1d8   :  { %1884 = vmatpush3.msra.mxu1 %v2458_v5 }
 0x1d9   :  { %1885 = vmatprep.subr.mxu1 %v2411_v0 }
 0x1da   :  { %1886 = vmatpush3.msra.mxu1 %v2460_v6 }
 0x1db   :  { %1887 = vmatprep.subr.mxu1 %v2411_v0 }
 0x1dc   :  { %1888 = vmatpush3.msra.mxu1 %v2464_v7 }
 0x1dd   :  { %1889 = vmatprep.subr.mxu1 %v2411_v0 }
 0x1de   :  { %1890 = vmatpush3.msra.mxu1 %v2474_v9 }
 0x1df   :  { %1891 = vmatprep.subr.mxu1 %v2411_v0 }
 0x1e0   :  { %1892 = vmatpush3.msra.mxu1 %v2480_v10 }
 0x1e1   :  { %1893 = vmatprep.subr.mxu1 %v2411_v0 }
 0x1e2   :  { %1894 = vmatpush3.msra.mxu1 %v2487_v12 }
 0x1e3   :  { %1895 = vmatprep.subr.mxu1 %v2411_v0 }
 0x1e4   :  { %1896 = vmatpush3.msra.mxu1 %v2498_v14 }
 0x1e5   :  { %1897 = vmatprep.subr.mxu1 %v2411_v0 }
 0x1e6   :  { %1898 = vmatpush3.msra.mxu1 %v2504_v15 }
 0x1e7   :  { %1899 = vmatprep.subr.mxu1 %v2411_v0 }
 0x1e8   :  { %1900 = vmatpush3.msra.mxu1 %v2510_v16 }
 0x1e9   :  { %1901 = vmatprep.subr.mxu1 %v2411_v0 }
 0x1ea   :  { %1902 = vmatpush3.msra.mxu1 %v2519_v18 }
 0x1eb   :  { %1903 = vmatprep.subr.mxu1 %v2411_v0 }
 0x1ec   :  { %1904 = vmatpush3.msra.mxu1 %v2528_v20 }
 0x1ed   :  { %1905 = vmatprep.subr.mxu1 %v2411_v0 }
 0x1ee   :  { %1906 = vmatpush3.msra.mxu1 %v2534_v21 }
 0x1ef   :  { %1907 = vmatprep.subr.mxu1 %v2411_v0 }
 0x1f0   :  { %1908 = vmatpush3.msra.mxu1 %v2540_v22 }
 0x1f1   :  { %1909 = vmatprep.subr.mxu1 %v2411_v0 }
 0x1f2   :  { %1910 = vmatpush3.msra.mxu1 %v2549_v24 }
 0x1f3   :  { %1911 = vmatprep.subr.mxu1 %v2411_v0 }
 0x1f4   :  { %1912 = vmatpush3.msra.mxu1 %v2555_v25 }
 0x1f5   :  { %1951 = vmatprep.subr.mxu1 %v2411_v0 }
 0x295   :  { %v462_v38 = vpop.f32.mrf.mxu1 }
 0x296   :  { %v463_v39 = vadd.f32 %v462_v38, %v2656_v33 }
 0x297   :  { %v1845_v40 = vpop.f32.mrf.mxu1 }
 0x298   :  { %2320 = vtanh.f32 %v463_v39 }
 0x2a5   :  { %v2321_v41 = vpop.eup %2320 }
 0x2a6   :  { %1879 = vmatmul.mubr.f32.vlgmr.msra.gmra.mxu0 %v2321_v41 }
 0x2a7   :  { %1917 = vmatpush3.msra.mxu0 %v2448_v2  ;;  %1948 = vmatprep.mubr.msk.f32.mxu0 %vm2412_vm0, %v2411_v0 }
 0x2a8   :  { %1918 = vmatprep.subr.mxu0 %v2411_v0 }
 0x2a9   :  { %1919 = vmatpush3.msra.mxu0 %v2458_v5 }
 0x2aa   :  { %1920 = vmatprep.subr.mxu0 %v2411_v0 }
 0x2ab   :  { %1921 = vmatpush3.msra.mxu0 %v2460_v6 }
 0x2ac   :  { %1922 = vmatprep.subr.mxu0 %v2411_v0 }
 0x2ad   :  { %1923 = vmatpush3.msra.mxu0 %v2464_v7 }
 0x2ae   :  { %1924 = vmatprep.subr.mxu0 %v2411_v0 }
 0x2af   :  { %1925 = vmatpush3.msra.mxu0 %v2474_v9 }
 0x2b0   :  { %1926 = vmatprep.subr.mxu0 %v2411_v0 }
 0x2b1   :  { %1927 = vmatpush3.msra.mxu0 %v2480_v10 }
 0x2b2   :  { %1928 = vmatprep.subr.mxu0 %v2411_v0 }
 0x2b3   :  { %1929 = vmatpush3.msra.mxu0 %v2487_v12 }
 0x2b4   :  { %1930 = vmatprep.subr.mxu0 %v2411_v0 }
 0x2b5   :  { %1931 = vmatpush3.msra.mxu0 %v2498_v14 }
 0x2b6   :  { %1932 = vmatprep.subr.mxu0 %v2411_v0 }
 0x2b7   :  { %1933 = vmatpush3.msra.mxu0 %v2504_v15 }
 0x2b8   :  { %1934 = vmatprep.subr.mxu0 %v2411_v0 }
 0x2b9   :  { %1935 = vmatpush3.msra.mxu0 %v2510_v16 }
 0x2ba   :  { %1936 = vmatprep.subr.mxu0 %v2411_v0 }
 0x2bb   :  { %1937 = vmatpush3.msra.mxu0 %v2519_v18 }
 0x2bc   :  { %1938 = vmatprep.subr.mxu0 %v2411_v0 }
 0x2bd   :  { %1939 = vmatpush3.msra.mxu0 %v2528_v20 }
 0x2be   :  { %1940 = vmatprep.subr.mxu0 %v2411_v0 }
 0x2bf   :  { %1941 = vmatpush3.msra.mxu0 %v2534_v21 }
 0x2c0   :  { %1942 = vmatprep.subr.mxu0 %v2411_v0 }
 0x2c1   :  { %1943 = vmatpush3.msra.mxu0 %v2540_v22 }
 0x2c2   :  { %1944 = vmatprep.subr.mxu0 %v2411_v0 }
 0x2c3   :  { %1945 = vmatpush3.msra.mxu0 %v2549_v24 }
 0x2c4   :  { %1946 = vmatprep.subr.mxu0 %v2411_v0 }
 0x2c5   :  { %1947 = vmatpush3.msra.mxu0 %v2555_v25 }
 0x2c6   :  { %1986 = vmatprep.subr.mxu0 %v2411_v0 }
 0x366   :  { %v534_v42 = vpop.f32.mrf.mxu0 }
 0x367   :  { %v535_v43 = vadd.f32 %v534_v42, %v2646_v19  ;;  %v3013_v19 = vld [vmem:[#allocation3 + $0x30] sm:$0xff] }
 0x368   :  { %v1880_v44 = vpop.f32.mrf.mxu0 }
 0x369   :  { %2322 = vtanh.f32 %v535_v43 }
 0x376   :  { %v2323_v45 = vpop.eup %2322 }
 0x377   :  { %1914 = vmatmul.mubr.f32.vlgmr.msra.gmra.mxu1 %v2323_v45 }
 0x378   :  { %1952 = vmatpush3.msra.mxu1 %v2448_v2  ;;  %1983 = vmatprep.mubr.msk.f32.mxu1 %vm2412_vm0, %v2411_v0 }
 0x379   :  { %1953 = vmatprep.subr.mxu1 %v2411_v0 }
 0x37a   :  { %1954 = vmatpush3.msra.mxu1 %v2458_v5 }
 0x37b   :  { %1955 = vmatprep.subr.mxu1 %v2411_v0 }
 0x37c   :  { %1956 = vmatpush3.msra.mxu1 %v2460_v6 }
 0x37d   :  { %1957 = vmatprep.subr.mxu1 %v2411_v0 }
 0x37e   :  { %1958 = vmatpush3.msra.mxu1 %v2464_v7 }
 0x37f   :  { %1959 = vmatprep.subr.mxu1 %v2411_v0 }
 0x380   :  { %1960 = vmatpush3.msra.mxu1 %v2474_v9 }
 0x381   :  { %1961 = vmatprep.subr.mxu1 %v2411_v0 }
 0x382   :  { %1962 = vmatpush3.msra.mxu1 %v2480_v10 }
 0x383   :  { %1963 = vmatprep.subr.mxu1 %v2411_v0 }
 0x384   :  { %1964 = vmatpush3.msra.mxu1 %v2487_v12 }
 0x385   :  { %1965 = vmatprep.subr.mxu1 %v2411_v0 }
 0x386   :  { %1966 = vmatpush3.msra.mxu1 %v2498_v14 }
 0x387   :  { %1967 = vmatprep.subr.mxu1 %v2411_v0 }
 0x388   :  { %1968 = vmatpush3.msra.mxu1 %v2504_v15 }
 0x389   :  { %1969 = vmatprep.subr.mxu1 %v2411_v0 }
 0x38a   :  { %1970 = vmatpush3.msra.mxu1 %v2510_v16 }
 0x38b   :  { %1971 = vmatprep.subr.mxu1 %v2411_v0 }
 0x38c   :  { %1972 = vmatpush3.msra.mxu1 %v2519_v18 }
 0x38d   :  { %1973 = vmatprep.subr.mxu1 %v2411_v0 }
 0x38e   :  { %1974 = vmatpush3.msra.mxu1 %v2528_v20 }
 0x38f   :  { %1975 = vmatprep.subr.mxu1 %v2411_v0 }
 0x390   :  { %1976 = vmatpush3.msra.mxu1 %v2534_v21 }
 0x391   :  { %1977 = vmatprep.subr.mxu1 %v2411_v0 }
 0x392   :  { %1978 = vmatpush3.msra.mxu1 %v2540_v22 }
 0x393   :  { %1979 = vmatprep.subr.mxu1 %v2411_v0 }
 0x394   :  { %1980 = vmatpush3.msra.mxu1 %v2549_v24 }
 0x395   :  { %1981 = vmatprep.subr.mxu1 %v2411_v0 }
 0x396   :  { %1982 = vmatpush3.msra.mxu1 %v2555_v25 }
 0x397   :  { %2021 = vmatprep.subr.mxu1 %v2411_v0 }
 0x437   :  { %v606_v46 = vpop.f32.mrf.mxu1 }
 0x438   :  { %v607_v47 = vadd.f32 %v606_v46, %v2630_v56 }
 0x439   :  { %v1915_v50 = vpop.f32.mrf.mxu1 }
 0x43a   :  { %2324 = vtanh.f32 %v607_v47 }
 0x447   :  { %v2325_v51 = vpop.eup %2324 }
 0x448   :  { %1949 = vmatmul.mubr.f32.vlgmr.msra.gmra.mxu0 %v2325_v51 }
 0x449   :  { %1987 = vmatpush3.msra.mxu0 %v2448_v2  ;;  %2018 = vmatprep.mubr.msk.f32.mxu0 %vm2412_vm0, %v2411_v0 }
 0x44a   :  { %1988 = vmatprep.subr.mxu0 %v2411_v0 }
 0x44b   :  { %1989 = vmatpush3.msra.mxu0 %v2458_v5 }
 0x44c   :  { %1990 = vmatprep.subr.mxu0 %v2411_v0 }
 0x44d   :  { %1991 = vmatpush3.msra.mxu0 %v2460_v6 }
 0x44e   :  { %1992 = vmatprep.subr.mxu0 %v2411_v0 }
 0x44f   :  { %1993 = vmatpush3.msra.mxu0 %v2464_v7 }
 0x450   :  { %1994 = vmatprep.subr.mxu0 %v2411_v0 }
 0x451   :  { %1995 = vmatpush3.msra.mxu0 %v2474_v9 }
 0x452   :  { %1996 = vmatprep.subr.mxu0 %v2411_v0 }
 0x453   :  { %1997 = vmatpush3.msra.mxu0 %v2480_v10 }
 0x454   :  { %1998 = vmatprep.subr.mxu0 %v2411_v0 }
 0x455   :  { %1999 = vmatpush3.msra.mxu0 %v2487_v12 }
 0x456   :  { %2000 = vmatprep.subr.mxu0 %v2411_v0 }
 0x457   :  { %2001 = vmatpush3.msra.mxu0 %v2498_v14 }
 0x458   :  { %2002 = vmatprep.subr.mxu0 %v2411_v0 }
 0x459   :  { %2003 = vmatpush3.msra.mxu0 %v2504_v15 }
 0x45a   :  { %2004 = vmatprep.subr.mxu0 %v2411_v0 }
 0x45b   :  { %2005 = vmatpush3.msra.mxu0 %v2510_v16 }
 0x45c   :  { %2006 = vmatprep.subr.mxu0 %v2411_v0 }
 0x45d   :  { %2007 = vmatpush3.msra.mxu0 %v2519_v18 }
 0x45e   :  { %2008 = vmatprep.subr.mxu0 %v2411_v0 }
 0x45f   :  { %2009 = vmatpush3.msra.mxu0 %v2528_v20 }
 0x460   :  { %2010 = vmatprep.subr.mxu0 %v2411_v0 }
 0x461   :  { %2011 = vmatpush3.msra.mxu0 %v2534_v21 }
 0x462   :  { %2012 = vmatprep.subr.mxu0 %v2411_v0 }
 0x463   :  { %2013 = vmatpush3.msra.mxu0 %v2540_v22 }
 0x464   :  { %2014 = vmatprep.subr.mxu0 %v2411_v0 }
 0x465   :  { %2015 = vmatpush3.msra.mxu0 %v2549_v24 }
 0x466   :  { %2016 = vmatprep.subr.mxu0 %v2411_v0 }
 0x467   :  { %2017 = vmatpush3.msra.mxu0 %v2555_v25 }
 0x468   :  { %2056 = vmatprep.subr.mxu0 %v2411_v0 }
 0x508   :  { %v678_v54 = vpop.f32.mrf.mxu0 }
 0x509   :  { %v679_v55 = vadd.f32 %v678_v54, %v2618_v48 }
 0x50a   :  { %v1950_v56 = vpop.f32.mrf.mxu0 }
 0x50b   :  { %2326 = vtanh.f32 %v679_v55 }
 0x518   :  { %v2327_v58 = vpop.eup %2326 }
 0x519   :  { %1984 = vmatmul.mubr.f32.vlgmr.msra.gmra.mxu1 %v2327_v58 }
 0x51a   :  { %2022 = vmatpush3.msra.mxu1 %v2448_v2  ;;  %2053 = vmatprep.mubr.msk.f32.mxu1 %vm2412_vm0, %v2411_v0 }
 0x51b   :  { %2023 = vmatprep.subr.mxu1 %v2411_v0 }
 0x51c   :  { %2024 = vmatpush3.msra.mxu1 %v2458_v5 }
 0x51d   :  { %2025 = vmatprep.subr.mxu1 %v2411_v0 }
 0x51e   :  { %2026 = vmatpush3.msra.mxu1 %v2460_v6 }
 0x51f   :  { %2027 = vmatprep.subr.mxu1 %v2411_v0 }
 0x520   :  { %2028 = vmatpush3.msra.mxu1 %v2464_v7 }
 0x521   :  { %2029 = vmatprep.subr.mxu1 %v2411_v0 }
 0x522   :  { %2030 = vmatpush3.msra.mxu1 %v2474_v9 }
 0x523   :  { %2031 = vmatprep.subr.mxu1 %v2411_v0 }
 0x524   :  { %2032 = vmatpush3.msra.mxu1 %v2480_v10 }
 0x525   :  { %2033 = vmatprep.subr.mxu1 %v2411_v0 }
 0x526   :  { %2034 = vmatpush3.msra.mxu1 %v2487_v12 }
 0x527   :  { %2035 = vmatprep.subr.mxu1 %v2411_v0 }
 0x528   :  { %2036 = vmatpush3.msra.mxu1 %v2498_v14 }
 0x529   :  { %2037 = vmatprep.subr.mxu1 %v2411_v0 }
 0x52a   :  { %2038 = vmatpush3.msra.mxu1 %v2504_v15 }
 0x52b   :  { %2039 = vmatprep.subr.mxu1 %v2411_v0 }
 0x52c   :  { %2040 = vmatpush3.msra.mxu1 %v2510_v16 }
 0x52d   :  { %2041 = vmatprep.subr.mxu1 %v2411_v0 }
 0x52e   :  { %2042 = vmatpush3.msra.mxu1 %v2519_v18 }
 0x52f   :  { %2043 = vmatprep.subr.mxu1 %v2411_v0 }
 0x530   :  { %2044 = vmatpush3.msra.mxu1 %v2528_v20 }
 0x531   :  { %2045 = vmatprep.subr.mxu1 %v2411_v0 }
 0x532   :  { %2046 = vmatpush3.msra.mxu1 %v2534_v21 }
 0x533   :  { %2047 = vmatprep.subr.mxu1 %v2411_v0 }
 0x534   :  { %2048 = vmatpush3.msra.mxu1 %v2540_v22 }
 0x535   :  { %2049 = vmatprep.subr.mxu1 %v2411_v0 }
 0x536   :  { %2050 = vmatpush3.msra.mxu1 %v2549_v24 }
 0x537   :  { %2051 = vmatprep.subr.mxu1 %v2411_v0 }
 0x538   :  { %2052 = vmatpush3.msra.mxu1 %v2555_v25 }
 0x539   :  { %2091 = vmatprep.subr.mxu1 %v2411_v0 }
 0x5d9   :  { %v750_v48 = vpop.f32.mrf.mxu1 }
 0x5da   :  { %v751_v59 = vadd.f32 %v750_v48, %v2636_v60 }
 0x5db   :  { %v1985_v62 = vpop.f32.mrf.mxu1 }
 0x5dc   :  { %2328 = vtanh.f32 %v751_v59 }
 0x5e9   :  { %v2329_v63 = vpop.eup %2328 }
 0x5ea   :  { %2019 = vmatmul.mubr.f32.vlgmr.msra.gmra.mxu0 %v2329_v63 }
 0x5eb   :  { %2057 = vmatpush3.msra.mxu0 %v2448_v2  ;;  %2088 = vmatprep.mubr.msk.f32.mxu0 %vm2412_vm0, %v2411_v0 }
 0x5ec   :  { %2058 = vmatprep.subr.mxu0 %v2411_v0 }
 0x5ed   :  { %2059 = vmatpush3.msra.mxu0 %v2458_v5 }
 0x5ee   :  { %2060 = vmatprep.subr.mxu0 %v2411_v0 }
 0x5ef   :  { %2061 = vmatpush3.msra.mxu0 %v2460_v6 }
 0x5f0   :  { %2062 = vmatprep.subr.mxu0 %v2411_v0 }
 0x5f1   :  { %2063 = vmatpush3.msra.mxu0 %v2464_v7 }
 0x5f2   :  { %2064 = vmatprep.subr.mxu0 %v2411_v0 }
 0x5f3   :  { %2065 = vmatpush3.msra.mxu0 %v2474_v9 }
 0x5f4   :  { %2066 = vmatprep.subr.mxu0 %v2411_v0 }
 0x5f5   :  { %2067 = vmatpush3.msra.mxu0 %v2480_v10 }
 0x5f6   :  { %2068 = vmatprep.subr.mxu0 %v2411_v0 }
 0x5f7   :  { %2069 = vmatpush3.msra.mxu0 %v2487_v12 }
 0x5f8   :  { %2070 = vmatprep.subr.mxu0 %v2411_v0 }
 0x5f9   :  { %2071 = vmatpush3.msra.mxu0 %v2498_v14 }
 0x5fa   :  { %2072 = vmatprep.subr.mxu0 %v2411_v0 }
 0x5fb   :  { %2073 = vmatpush3.msra.mxu0 %v2504_v15 }
 0x5fc   :  { %2074 = vmatprep.subr.mxu0 %v2411_v0 }
 0x5fd   :  { %2075 = vmatpush3.msra.mxu0 %v2510_v16 }
 0x5fe   :  { %2076 = vmatprep.subr.mxu0 %v2411_v0 }
 0x5ff   :  { %2077 = vmatpush3.msra.mxu0 %v2519_v18 }
 0x600   :  { %2078 = vmatprep.subr.mxu0 %v2411_v0 }
 0x601   :  { %2079 = vmatpush3.msra.mxu0 %v2528_v20 }
 0x602   :  { %2080 = vmatprep.subr.mxu0 %v2411_v0 }
 0x603   :  { %2081 = vmatpush3.msra.mxu0 %v2534_v21 }
 0x604   :  { %2082 = vmatprep.subr.mxu0 %v2411_v0 }
 0x605   :  { %2083 = vmatpush3.msra.mxu0 %v2540_v22 }
 0x606   :  { %2084 = vmatprep.subr.mxu0 %v2411_v0 }
 0x607   :  { %2085 = vmatpush3.msra.mxu0 %v2549_v24 }
 0x608   :  { %2086 = vmatprep.subr.mxu0 %v2411_v0 }
 0x609   :  { %2087 = vmatpush3.msra.mxu0 %v2555_v25 }
 0x60a   :  { %2126 = vmatprep.subr.mxu0 %v2411_v0 }
 0x6aa   :  { %v822_v60 = vpop.f32.mrf.mxu0 }
 0x6ab   :  { %v823_v1 = vadd.f32 %v822_v60, %v2624_v52  ;;  %v2940_v52 = vld [vmem:[#allocation3 + $0x78] sm:$0xff] }
 0x6ac   :  { %v2020_v3 = vpop.f32.mrf.mxu0 }
 0x6ad   :  { %2330 = vtanh.f32 %v823_v1 }
 0x6ba   :  { %v2331_v8 = vpop.eup %2330 }
 0x6bb   :  { %2054 = vmatmul.mubr.f32.vlgmr.msra.gmra.mxu1 %v2331_v8 }
 0x6bc   :  { %2092 = vmatpush3.msra.mxu1 %v2448_v2  ;;  %2123 = vmatprep.mubr.msk.f32.mxu1 %vm2412_vm0, %v2411_v0 }
 0x6bd   :  { %2093 = vmatprep.subr.mxu1 %v2411_v0 }
 0x6be   :  { %2094 = vmatpush3.msra.mxu1 %v2458_v5 }
 0x6bf   :  { %2095 = vmatprep.subr.mxu1 %v2411_v0 }
 0x6c0   :  { %2096 = vmatpush3.msra.mxu1 %v2460_v6 }
 0x6c1   :  { %2097 = vmatprep.subr.mxu1 %v2411_v0 }
 0x6c2   :  { %2098 = vmatpush3.msra.mxu1 %v2464_v7 }
 0x6c3   :  { %2099 = vmatprep.subr.mxu1 %v2411_v0 }
 0x6c4   :  { %2100 = vmatpush3.msra.mxu1 %v2474_v9 }
 0x6c5   :  { %2101 = vmatprep.subr.mxu1 %v2411_v0 }
 0x6c6   :  { %2102 = vmatpush3.msra.mxu1 %v2480_v10 }
 0x6c7   :  { %2103 = vmatprep.subr.mxu1 %v2411_v0 }
 0x6c8   :  { %2104 = vmatpush3.msra.mxu1 %v2487_v12 }
 0x6c9   :  { %2105 = vmatprep.subr.mxu1 %v2411_v0 }
 0x6ca   :  { %2106 = vmatpush3.msra.mxu1 %v2498_v14 }
 0x6cb   :  { %2107 = vmatprep.subr.mxu1 %v2411_v0 }
 0x6cc   :  { %2108 = vmatpush3.msra.mxu1 %v2504_v15 }
 0x6cd   :  { %2109 = vmatprep.subr.mxu1 %v2411_v0 }
 0x6ce   :  { %2110 = vmatpush3.msra.mxu1 %v2510_v16 }
 0x6cf   :  { %2111 = vmatprep.subr.mxu1 %v2411_v0 }
 0x6d0   :  { %2112 = vmatpush3.msra.mxu1 %v2519_v18 }
 0x6d1   :  { %2113 = vmatprep.subr.mxu1 %v2411_v0 }
 0x6d2   :  { %2114 = vmatpush3.msra.mxu1 %v2528_v20 }
 0x6d3   :  { %2115 = vmatprep.subr.mxu1 %v2411_v0 }
 0x6d4   :  { %2116 = vmatpush3.msra.mxu1 %v2534_v21 }
 0x6d5   :  { %2117 = vmatprep.subr.mxu1 %v2411_v0 }
 0x6d6   :  { %2118 = vmatpush3.msra.mxu1 %v2540_v22 }
 0x6d7   :  { %2119 = vmatprep.subr.mxu1 %v2411_v0 }
 0x6d8   :  { %2120 = vmatpush3.msra.mxu1 %v2549_v24 }
 0x6d9   :  { %2121 = vmatprep.subr.mxu1 %v2411_v0 }
 0x6da   :  { %2122 = vmatpush3.msra.mxu1 %v2555_v25 }
 0x6db   :  { %2161 = vmatprep.subr.mxu1 %v2411_v0 }
 0x77b   :  { %v894_v2 = vpop.f32.mrf.mxu1 }
 0x77c   :  { %v895_v5 = vadd.f32 %v894_v2, %v2627_v53  ;;  %v2950_v53 = vld [vmem:[#allocation3 + $0x68] sm:$0xff] }
 0x77d   :  { %v2055_v6 = vpop.f32.mrf.mxu1 }
 0x77e   :  { %2332 = vtanh.f32 %v895_v5 }
 0x78b   :  { %v2333_v7 = vpop.eup %2332 }
 0x78c   :  { %2089 = vmatmul.mubr.f32.vlgmr.msra.gmra.mxu0 %v2333_v7 }
 0x78d   :  { %2127 = vmatpush3.msra.mxu0 %v2940_v52  ;;  %2158 = vmatprep.mubr.msk.f32.mxu0 %vm2412_vm0, %v2411_v0 }
 0x78e   :  { %2128 = vmatprep.subr.mxu0 %v2411_v0 }
 0x78f   :  { %2129 = vmatpush3.msra.mxu0 %v2946_v11 }
 0x790   :  { %2130 = vmatprep.subr.mxu0 %v2411_v0 }
 0x791   :  { %2131 = vmatpush3.msra.mxu0 %v2950_v53 }
 0x792   :  { %2132 = vmatprep.subr.mxu0 %v2411_v0 }
 0x793   :  { %2133 = vmatpush3.msra.mxu0 %v2954_v13 }
 0x794   :  { %2134 = vmatprep.subr.mxu0 %v2411_v0 }
 0x795   :  { %2135 = vmatpush3.msra.mxu0 %v2474_v9 }
 0x796   :  { %2136 = vmatprep.subr.mxu0 %v2411_v0 }
 0x797   :  { %2137 = vmatpush3.msra.mxu0 %v2480_v10 }
 0x798   :  { %2138 = vmatprep.subr.mxu0 %v2411_v0 }
 0x799   :  { %2139 = vmatpush3.msra.mxu0 %v2487_v12 }
 0x79a   :  { %2140 = vmatprep.subr.mxu0 %v2411_v0 }
 0x79b   :  { %2141 = vmatpush3.msra.mxu0 %v2498_v14 }
 0x79c   :  { %2142 = vmatprep.subr.mxu0 %v2411_v0 }
 0x79d   :  { %2143 = vmatpush3.msra.mxu0 %v2504_v15  ;;  %v2993_v15 = vld [vmem:[#allocation3 + $0x58] sm:$0xff] }
 0x79e   :  { %2144 = vmatprep.subr.mxu0 %v2411_v0 }
 0x79f   :  { %2145 = vmatpush3.msra.mxu0 %v2510_v16  ;;  %v2997_v16 = vld [vmem:[#allocation3 + $0x50] sm:$0xff] }
 0x7a0   :  { %2146 = vmatprep.subr.mxu0 %v2411_v0 }
 0x7a1   :  { %2147 = vmatpush3.msra.mxu0 %v2519_v18  ;;  %v3001_v18 = vld [vmem:[#allocation3 + $0x48] sm:$0xff] }
 0x7a2   :  { %2148 = vmatprep.subr.mxu0 %v2411_v0 }
 0x7a3   :  { %2149 = vmatpush3.msra.mxu0 %v2528_v20 }
 0x7a4   :  { %2150 = vmatprep.subr.mxu0 %v2411_v0 }
 0x7a5   :  { %2151 = vmatpush3.msra.mxu0 %v2534_v21 }
 0x7a6   :  { %2152 = vmatprep.subr.mxu0 %v2411_v0 }
 0x7a7   :  { %2153 = vmatpush3.msra.mxu0 %v2540_v22 }
 0x7a8   :  { %2154 = vmatprep.subr.mxu0 %v2411_v0 }
 0x7a9   :  { %2155 = vmatpush3.msra.mxu0 %v2549_v24 }
 0x7aa   :  { %2156 = vmatprep.subr.mxu0 %v2411_v0 }
 0x7ab   :  { %2157 = vmatpush3.msra.mxu0 %v2555_v25 }
 0x7ac   :  { %2196 = vmatprep.subr.mxu0 %v2411_v0 }
 0x84c   :  { %v966_v9 = vpop.f32.mrf.mxu0 }
 0x84d   :  { %v967_v10 = vadd.f32 %v966_v9, %v2639_v61  ;;  %v3005_v61 = vld [vmem:[#allocation3 + $0x40] sm:$0xff] }
 0x84e   :  { %v2090_v12 = vpop.f32.mrf.mxu0 }
 0x84f   :  { %2334 = vtanh.f32 %v967_v10 }
 0x85c   :  { %v2335_v14 = vpop.eup %2334 }
 0x85d   :  { %2124 = vmatmul.mubr.f32.vlgmr.msra.gmra.mxu1 %v2335_v14 }
 0x85e   :  { %2162 = vmatpush3.msra.mxu1 %v2940_v52  ;;  %2193 = vmatprep.mubr.msk.f32.mxu1 %vm2412_vm0, %v2411_v0 }
 0x85f   :  { %2163 = vmatprep.subr.mxu1 %v2411_v0 }
 0x860   :  { %2164 = vmatpush3.msra.mxu1 %v2946_v11 }
 0x861   :  { %2165 = vmatprep.subr.mxu1 %v2411_v0 }
 0x862   :  { %2166 = vmatpush3.msra.mxu1 %v2950_v53 }
 0x863   :  { %2167 = vmatprep.subr.mxu1 %v2411_v0 }
 0x864   :  { %2168 = vmatpush3.msra.mxu1 %v2954_v13 }
 0x865   :  { %2169 = vmatprep.subr.mxu1 %v2411_v0 }
 0x866   :  { %2170 = vmatpush3.msra.mxu1 %v2993_v15 }
 0x867   :  { %2171 = vmatprep.subr.mxu1 %v2411_v0 }
 0x868   :  { %2172 = vmatpush3.msra.mxu1 %v2997_v16 }
 0x869   :  { %2173 = vmatprep.subr.mxu1 %v2411_v0 }
 0x86a   :  { %2174 = vmatpush3.msra.mxu1 %v3001_v18 }
 0x86b   :  { %2175 = vmatprep.subr.mxu1 %v2411_v0 }
 0x86c   :  { %2176 = vmatpush3.msra.mxu1 %v3005_v61 }
 0x86d   :  { %2177 = vmatprep.subr.mxu1 %v2411_v0 }
 0x86e   :  { %2178 = vmatpush3.msra.mxu1 %v3009_v17 }
 0x86f   :  { %2179 = vmatprep.subr.mxu1 %v2411_v0 }
 0x870   :  { %2180 = vmatpush3.msra.mxu1 %v3013_v19 }
 0x871   :  { %2181 = vmatprep.subr.mxu1 %v2411_v0 }
 0x872   :  { %2182 = vmatpush3.msra.mxu1 %v3017_v27 }
 0x873   :  { %2183 = vmatprep.subr.mxu1 %v2411_v0 }
 0x874   :  { %2184 = vmatpush3.msra.mxu1 %v2528_v20 }
 0x875   :  { %2185 = vmatprep.subr.mxu1 %v2411_v0 }
 0x876   :  { %2186 = vmatpush3.msra.mxu1 %v2534_v21 }
 0x877   :  { %2187 = vmatprep.subr.mxu1 %v2411_v0 }
 0x878   :  { %2188 = vmatpush3.msra.mxu1 %v2540_v22  ;;  %v3056_v22 = vld [vmem:[#allocation3 + $0x20] sm:$0xff] }
 0x879   :  { %2189 = vmatprep.subr.mxu1 %v2411_v0 }
 0x87a   :  { %2190 = vmatpush3.msra.mxu1 %v2549_v24  ;;  %v3060_v24 = vld [vmem:[#allocation3 + $0x18] sm:$0xff] }
 0x87b   :  { %2191 = vmatprep.subr.mxu1 %v2411_v0 }
 0x87c   :  { %2192 = vmatpush3.msra.mxu1 %v2555_v25  ;;  %v3064_v25 = vld [vmem:[#allocation3 + $0x10] sm:$0xff] }
 0x87d   :  { %2231 = vmatprep.subr.mxu1 %v2411_v0 }
 0x91d   :  { %v1038_v30 = vpop.f32.mrf.mxu1 }
 0x91e   :  { %v1039_v20 = vadd.f32 %v1038_v30, %v2621_v49  ;;  %v3068_v49 = vld [vmem:[#allocation3 + $0x8] sm:$0xff] }
 0x91f   :  { %v2125_v32 = vpop.f32.mrf.mxu1 }
 0x920   :  { %2336 = vtanh.f32 %v1039_v20 }
 0x92d   :  { %v2337_v21 = vpop.eup %2336 }
 0x92e   :  { %2159 = vmatmul.mubr.f32.vlgmr.msra.gmra.mxu0 %v2337_v21 }
 0x92f   :  { %2197 = vmatpush3.msra.mxu0 %v2940_v52  ;;  %2228 = vmatprep.mubr.msk.f32.mxu0 %vm2412_vm0, %v2411_v0 }
 0x930   :  { %2198 = vmatprep.subr.mxu0 %v2411_v0 }
 0x931   :  { %2199 = vmatpush3.msra.mxu0 %v2946_v11 }
 0x932   :  { %2200 = vmatprep.subr.mxu0 %v2411_v0 }
 0x933   :  { %2201 = vmatpush3.msra.mxu0 %v2950_v53 }
 0x934   :  { %2202 = vmatprep.subr.mxu0 %v2411_v0 }
 0x935   :  { %2203 = vmatpush3.msra.mxu0 %v2954_v13 }
 0x936   :  { %2204 = vmatprep.subr.mxu0 %v2411_v0 }
 0x937   :  { %2205 = vmatpush3.msra.mxu0 %v2993_v15 }
 0x938   :  { %2206 = vmatprep.subr.mxu0 %v2411_v0 }
 0x939   :  { %2207 = vmatpush3.msra.mxu0 %v2997_v16 }
 0x93a   :  { %2208 = vmatprep.subr.mxu0 %v2411_v0 }
 0x93b   :  { %2209 = vmatpush3.msra.mxu0 %v3001_v18 }
 0x93c   :  { %2210 = vmatprep.subr.mxu0 %v2411_v0 }
 0x93d   :  { %2211 = vmatpush3.msra.mxu0 %v3005_v61 }
 0x93e   :  { %2212 = vmatprep.subr.mxu0 %v2411_v0 }
 0x93f   :  { %2213 = vmatpush3.msra.mxu0 %v3009_v17 }
 0x940   :  { %2214 = vmatprep.subr.mxu0 %v2411_v0 }
 0x941   :  { %2215 = vmatpush3.msra.mxu0 %v3013_v19 }
 0x942   :  { %2216 = vmatprep.subr.mxu0 %v2411_v0 }
 0x943   :  { %2217 = vmatpush3.msra.mxu0 %v3017_v27 }
 0x944   :  { %2218 = vmatprep.subr.mxu0 %v2411_v0 }
 0x945   :  { %2219 = vmatpush3.msra.mxu0 %v3056_v22 }
 0x946   :  { %2220 = vmatprep.subr.mxu0 %v2411_v0 }
 0x947   :  { %2221 = vmatpush3.msra.mxu0 %v3060_v24 }
 0x948   :  { %2222 = vmatprep.subr.mxu0 %v2411_v0 }
 0x949   :  { %2223 = vmatpush3.msra.mxu0 %v3064_v25 }
 0x94a   :  { %2224 = vmatprep.subr.mxu0 %v2411_v0 }
 0x94b   :  { %2225 = vmatpush3.msra.mxu0 %v3068_v49 }
 0x94c   :  { %2226 = vmatprep.subr.mxu0 %v2411_v0 }
 0x94d   :  { %2227 = vmatpush3.msra.mxu0 %v3072_v35 }
 0x94e   :  { %2266 = vmatprep.subr.mxu0 %v2411_v0 }
 0x9ee   :  { %v1110_v33 = vpop.f32.mrf.mxu0 }
 0x9ef   :  { %v1111_v36 = vadd.f32 %v1110_v33, %v2633_v57 }
 0x9f0   :  { %v2160_v26 = vpop.f32.mrf.mxu0 }
 0x9f1   :  { %2338 = vtanh.f32 %v1111_v36 }
 0x9fe   :  { %v2339_v28 = vpop.eup %2338 }
 0x9ff   :  { %2194 = vmatmul.mubr.f32.vlgmr.msra.gmra.mxu1 %v2339_v28 }
 0xa00   :  { %2232 = vmatpush3.msra.mxu1 %v2940_v52  ;;  %2263 = vmatprep.mubr.msk.f32.mxu1 %vm2412_vm0, %v2411_v0 }
 0xa01   :  { %2233 = vmatprep.subr.mxu1 %v2411_v0 }
 0xa02   :  { %2234 = vmatpush3.msra.mxu1 %v2946_v11 }
 0xa03   :  { %2235 = vmatprep.subr.mxu1 %v2411_v0 }
 0xa04   :  { %2236 = vmatpush3.msra.mxu1 %v2950_v53 }
 0xa05   :  { %2237 = vmatprep.subr.mxu1 %v2411_v0 }
 0xa06   :  { %2238 = vmatpush3.msra.mxu1 %v2954_v13 }
 0xa07   :  { %2239 = vmatprep.subr.mxu1 %v2411_v0 }
 0xa08   :  { %2240 = vmatpush3.msra.mxu1 %v2993_v15 }
 0xa09   :  { %2241 = vmatprep.subr.mxu1 %v2411_v0 }
 0xa0a   :  { %2242 = vmatpush3.msra.mxu1 %v2997_v16 }
 0xa0b   :  { %2243 = vmatprep.subr.mxu1 %v2411_v0 }
 0xa0c   :  { %2244 = vmatpush3.msra.mxu1 %v3001_v18 }
 0xa0d   :  { %2245 = vmatprep.subr.mxu1 %v2411_v0 }
 0xa0e   :  { %2246 = vmatpush3.msra.mxu1 %v3005_v61 }
 0xa0f   :  { %2247 = vmatprep.subr.mxu1 %v2411_v0 }
 0xa10   :  { %2248 = vmatpush3.msra.mxu1 %v3009_v17 }
 0xa11   :  { %2249 = vmatprep.subr.mxu1 %v2411_v0 }
 0xa12   :  { %2250 = vmatpush3.msra.mxu1 %v3013_v19 }
 0xa13   :  { %2251 = vmatprep.subr.mxu1 %v2411_v0 }
 0xa14   :  { %2252 = vmatpush3.msra.mxu1 %v3017_v27 }
 0xa15   :  { %2253 = vmatprep.subr.mxu1 %v2411_v0 }
 0xa16   :  { %2254 = vmatpush3.msra.mxu1 %v3056_v22 }
 0xa17   :  { %2255 = vmatprep.subr.mxu1 %v2411_v0 }
 0xa18   :  { %2256 = vmatpush3.msra.mxu1 %v3060_v24 }
 0xa19   :  { %2257 = vmatprep.subr.mxu1 %v2411_v0 }
 0xa1a   :  { %2258 = vmatpush3.msra.mxu1 %v3064_v25 }
 0xa1b   :  { %2259 = vmatprep.subr.mxu1 %v2411_v0 }
 0xa1c   :  { %2260 = vmatpush3.msra.mxu1 %v3068_v49 }
 0xa1d   :  { %2261 = vmatprep.subr.mxu1 %v2411_v0 }
 0xa1e   :  { %2262 = vmatpush3.msra.mxu1 %v3072_v35 }
 0xabf   :  { %v1182_v57 = vpop.f32.mrf.mxu1 }
 0xac0   :  { %v1183_v31 = vadd.f32 %v1182_v57, %v2649_v23 }
 0xac1   :  { %v2195_v37 = vpop.f32.mrf.mxu1 }
 0xac2   :  { %2340 = vtanh.f32 %v1183_v31 }
 0xacf   :  { %v2341_v38 = vpop.eup %2340 }
 0xad0   :  { %2229 = vmatmul.mubr.f32.vlgmr.msra.gmra.mxu0 %v2341_v38 }
 0xad1   :  { %2267 = vmatpush3.msra.mxu0 %v2940_v52  ;;  %2298 = vmatprep.mubr.msk.f32.mxu0 %vm2412_vm0, %v2411_v0 }
 0xad2   :  { %2268 = vmatprep.subr.mxu0 %v2411_v0 }
 0xad3   :  { %2269 = vmatpush3.msra.mxu0 %v2946_v11 }
 0xad4   :  { %2270 = vmatprep.subr.mxu0 %v2411_v0 }
 0xad5   :  { %2271 = vmatpush3.msra.mxu0 %v2950_v53 }
 0xad6   :  { %2272 = vmatprep.subr.mxu0 %v2411_v0 }
 0xad7   :  { %2273 = vmatpush3.msra.mxu0 %v2954_v13 }
 0xad8   :  { %2274 = vmatprep.subr.mxu0 %v2411_v0 }
 0xad9   :  { %2275 = vmatpush3.msra.mxu0 %v2993_v15 }
 0xada   :  { %2276 = vmatprep.subr.mxu0 %v2411_v0 }
 0xadb   :  { %2277 = vmatpush3.msra.mxu0 %v2997_v16 }
 0xadc   :  { %2278 = vmatprep.subr.mxu0 %v2411_v0 }
 0xadd   :  { %2279 = vmatpush3.msra.mxu0 %v3001_v18 }
 0xade   :  { %2280 = vmatprep.subr.mxu0 %v2411_v0 }
 0xadf   :  { %2281 = vmatpush3.msra.mxu0 %v3005_v61 }
 0xae0   :  { %2282 = vmatprep.subr.mxu0 %v2411_v0 }
 0xae1   :  { %2283 = vmatpush3.msra.mxu0 %v3009_v17 }
 0xae2   :  { %2284 = vmatprep.subr.mxu0 %v2411_v0 }
 0xae3   :  { %2285 = vmatpush3.msra.mxu0 %v3013_v19 }
 0xae4   :  { %2286 = vmatprep.subr.mxu0 %v2411_v0 }
 0xae5   :  { %2287 = vmatpush3.msra.mxu0 %v3017_v27 }
 0xae6   :  { %2288 = vmatprep.subr.mxu0 %v2411_v0 }
 0xae7   :  { %2289 = vmatpush3.msra.mxu0 %v3056_v22 }
 0xae8   :  { %2290 = vmatprep.subr.mxu0 %v2411_v0 }
 0xae9   :  { %2291 = vmatpush3.msra.mxu0 %v3060_v24 }
 0xaea   :  { %2292 = vmatprep.subr.mxu0 %v2411_v0 }
 0xaeb   :  { %2293 = vmatpush3.msra.mxu0 %v3064_v25 }
 0xaec   :  { %2294 = vmatprep.subr.mxu0 %v2411_v0 }
 0xaed   :  { %2295 = vmatpush3.msra.mxu0 %v3068_v49 }
 0xaee   :  { %2296 = vmatprep.subr.mxu0 %v2411_v0 }
 0xaef   :  { %2297 = vmatpush3.msra.mxu0 %v3072_v35 }
 0xb90   :  { %v1254_v23 = vpop.f32.mrf.mxu0 }
 0xb91   :  { %v1255_v39 = vadd.f32 %v1254_v23, %v2659_v29 }
 0xb92   :  { %v2230_v40 = vpop.f32.mrf.mxu0 }
 0xb93   :  { %2342 = vtanh.f32 %v1255_v39 }
 0xba0   :  { %v2343_v41 = vpop.eup %2342 }
 0xba1   :  { %2264 = vmatmul.mubr.f32.vlgmr.msra.gmra.mxu1 %v2343_v41 }
 0xc61   :  { %v1326_v42 = vpop.f32.mrf.mxu1 }
 0xc62   :  { %v1327_v43 = vadd.f32 %v1326_v42, %v2643_v4 }
 0xc63   :  { %v2265_v44 = vpop.f32.mrf.mxu1 }
 0xc64   :  { %2344 = vtanh.f32 %v1327_v43 }
 0xc71   :  { %v2345_v45 = vpop.eup %2344 }
 0xc72   :  { %2299 = vmatmul.mubr.f32.vlgmr.msra.gmra.mxu0 %v2345_v45 }
 0xd32   :  { %v1398_v46 = vpop.f32.mrf.mxu0 }
 0xd33   :  { %v1399_v47 = vadd.f32 %v1398_v46, %v2653_v34 }
 0xd34   :  { %v2300_v0 = vpop.f32.mrf.mxu0 }
 0xd35   :  { %2346 = vtanh.f32 %v1399_v47 }
 0xd42   :  { %v2347_v29 = vpop.eup %2346 }
 0xd43   :  { %1408 = vst [vmem:[#allocation6] sm:$0xff] %v2347_v29 }
 0xd44   :  { %2395 = shalt.err (!%p2392_p9)
}
 0xd45   :  { %1418 = dma.vmem_to_hbm [thread:$0]  %s1416_s13, 128, %s3154_s4, [#allocation5]  }
 0xd46   :  { %2406 = dma.done.wait [#allocation5], 128  }
 0xd47   :  { %2407 = vsyncadd [#allocation5], 4294967168 }
 0xd48   :  { %1422 = vsyncpa [#allocation4], 1 }
 0xd49   :  { %1423 = vsyncpa [#allocation5], 1 }

</bundles_post_ra>
